<compile_context>
chip_gen: v6e
topology: v6e:2x2x1
jax: 0.10.0
libtpu: 0.0.40
codegen_flags: <defaults>
</compile_context>

<pallas_src>
import functools

import jax
import jax.numpy as jnp
from jax import lax
from jax.experimental import pallas as pl
from jax.experimental.pallas import tpu as pltpu


# -----------------------------------------------------------------------------
# Kernel: hoisted input projections + fused bidirectional recurrence +
#         time max-pool + highway + logit, all in VMEM.
# -----------------------------------------------------------------------------
def highway_bilstm_kernel(x2d_ref,                     # (S*B, D)  embedded input (flat)
                          wihf_ref, whhf_ref, bf_ref,  # fwd LSTM: (D,4H),(H,4H),(1,4H)
                          wihb_ref, whhb_ref, bb_ref,  # bwd LSTM: (D,4H),(H,4H),(1,4H)
                          wh2l_ref, bh2l_ref,          # highway linear: (2H,2H),(1,2H)
                          wg_ref, bg_ref,              # gate linear:    (2H,2H),(1,2H)
                          wlog_ref, blog_ref,          # logit linear:   (2H,Cp),(1,Cp)
                          out_ref,                     # (B, Cp)
                          gxf_ref, gxb_ref,            # scratch: (S, B, 4H) each
                          *, seq_len):
    S = seq_len
    SB, D = x2d_ref.shape
    B = SB // S
    H = whhf_ref.shape[0]

    # ---- Hoisted input projection: two big MXU matmuls, biases folded in ----
    x2d = x2d_ref[...]
    gxf_ref[...] = (jnp.dot(x2d, wihf_ref[...], preferred_element_type=jnp.float32)
                    + bf_ref[...]).reshape(S, B, 4 * H)
    gxb_ref[...] = (jnp.dot(x2d, wihb_ref[...], preferred_element_type=jnp.float32)
                    + bb_ref[...]).reshape(S, B, 4 * H)

    # Loop-invariant recurrent weights, loaded once.
    w_hh_f = whhf_ref[...]
    w_hh_b = whhb_ref[...]

    def cell(gates, c):
        # PyTorch gate order: i, f, g, o
        i_g = jax.nn.sigmoid(gates[:, 0:H])
        f_g = jax.nn.sigmoid(gates[:, H:2 * H])
        g_g = jnp.tanh(gates[:, 2 * H:3 * H])
        o_g = jax.nn.sigmoid(gates[:, 3 * H:4 * H])
        c_new = f_g * c + i_g * g_g
        h_new = o_g * jnp.tanh(c_new)
        return h_new, c_new

    zeros = jnp.zeros((B, H), jnp.float32)
    ninf = jnp.full((B, H), -jnp.inf, jnp.float32)

    # ---- Fused forward/backward recurrence: one loop of length S ----
    def step(t, carry):
        h_f, c_f, m_f, h_b, c_b, m_b = carry
        gates_f = gxf_ref[t] + jnp.dot(h_f, w_hh_f,
                                       preferred_element_type=jnp.float32)
        gates_b = gxb_ref[S - 1 - t] + jnp.dot(h_b, w_hh_b,
                                               preferred_element_type=jnp.float32)
        h_f, c_f = cell(gates_f, c_f)
        h_b, c_b = cell(gates_b, c_b)
        return (h_f, c_f, jnp.maximum(m_f, h_f),
                h_b, c_b, jnp.maximum(m_b, h_b))

    carry = lax.fori_loop(0, S, step,
                          (zeros, zeros, ninf, zeros, zeros, ninf),
                          unroll=True)
    m_fwd, m_bwd = carry[2], carry[5]

    # max_pool1d over time of concat(h_fwd, h_bwd) == concat of per-direction maxes
    pooled = jnp.concatenate([m_fwd, m_bwd], axis=-1)               # (B, 2H)

    h2l = (jnp.dot(jnp.tanh(pooled), wh2l_ref[...],
                   preferred_element_type=jnp.float32) + bh2l_ref[...])
    gate = jax.nn.sigmoid(jnp.dot(pooled, wg_ref[...],
                                  preferred_element_type=jnp.float32) + bg_ref[...])
    highway = h2l * gate + (1.0 - gate) * pooled                    # (B, 2H)
    out_ref[...] = (jnp.dot(highway, wlog_ref[...],
                            preferred_element_type=jnp.float32) + blog_ref[...])


# -----------------------------------------------------------------------------
# Wrapper: embedding gather (glue), batch/lane padding, single pallas_call.
# -----------------------------------------------------------------------------
def highway_bilstm_forward(ids, params):
    emb = params["embedding"][ids].astype(jnp.float32)              # (S, B, D)
    S, B, D = emb.shape
    H = params["w_hh_f"].shape[0]
    C = params["w_logit"].shape[1]

    # Pad batch to a full sublane extent and logits to a full lane extent.
    Bp = ((max(B, 8) + 7) // 8) * 8
    Cp = ((max(C, 128) + 127) // 128) * 128

    emb_p = jnp.pad(emb, ((0, 0), (0, Bp - B), (0, 0)))             # (S, Bp, D)
    x2d = emb_p.reshape(S * Bp, D)                                  # (S*Bp, D)
    w_log_p = jnp.pad(params["w_logit"], ((0, 0), (0, Cp - C)))     # (2H, Cp)
    b_log_p = jnp.pad(params["b_logit"], ((0, 0), (0, Cp - C)))     # (1, Cp)

    inputs = (x2d,
              params["w_ih_f"], params["w_hh_f"], params["b_f"],
              params["w_ih_b"], params["w_hh_b"], params["b_b"],
              params["w_h2l"], params["b_h2l"],
              params["w_gate"], params["b_gate"],
              w_log_p, b_log_p)

    vmem = pl.BlockSpec(memory_space=pltpu.MemorySpace.VMEM)        # whole-array blocks
    out = pl.pallas_call(
        functools.partial(highway_bilstm_kernel, seq_len=S),
        out_shape=jax.ShapeDtypeStruct((Bp, Cp), jnp.float32),
        in_specs=[vmem] * len(inputs),
        out_specs=vmem,
        scratch_shapes=[pltpu.VMEM((S, Bp, 4 * H), jnp.float32),
                        pltpu.VMEM((S, Bp, 4 * H), jnp.float32)],
    )(*inputs)
    return out[:B, :C]


# -----------------------------------------------------------------------------
# Deterministic parameter init (shapes follow the PyTorch module; transposed to
# right-multiply layout inside the kernel).
# -----------------------------------------------------------------------------
def init_params(key, V, D, H, C):
    ks = jax.random.split(key, 12)

    def w(k, shape, scale=0.2):
        return scale * jax.random.normal(k, shape, dtype=jnp.float32)

    embedding = w(ks[0], (V, D), 0.5)

    def lstm_dir(k1, k2):
        w_ih = w(k1, (4 * H, D)).T                                  # (D, 4H)
        w_hh = w(k2, (4 * H, H)).T                                  # (H, 4H)
        # Combined bias (b_ih + b_hh). The module fills the forget-gate slice of
        # BOTH b_ih and b_hh with 1.0, so the combined forget bias is 2.0.
        b = jnp.zeros((1, 4 * H), jnp.float32).at[:, H:2 * H].set(2.0)
        return w_ih, w_hh, b

    w_ih_f, w_hh_f, b_f = lstm_dir(ks[1], ks[2])
    w_ih_b, w_hh_b, b_b = lstm_dir(ks[3], ks[4])

    w_h2l = w(ks[5], (2 * H, 2 * H)).T
    b_h2l = w(ks[6], (1, 2 * H), 0.1)
    w_gate = w(ks[7], (2 * H, 2 * H)).T
    b_gate = w(ks[8], (1, 2 * H), 0.1)
    w_logit = w(ks[9], (C, 2 * H)).T                                # (2H, C)
    b_logit = w(ks[10], (1, C), 0.1)

    return dict(embedding=embedding,
                w_ih_f=w_ih_f, w_hh_f=w_hh_f, b_f=b_f,
                w_ih_b=w_ih_b, w_hh_b=w_hh_b, b_b=b_b,
                w_h2l=w_h2l, b_h2l=b_h2l,
                w_gate=w_gate, b_gate=b_gate,
                w_logit=w_logit, b_logit=b_logit)


# -----------------------------------------------------------------------------
# Pure-JAX reference (mirrors the PyTorch forward) for a sanity check.
# -----------------------------------------------------------------------------
def reference_forward(ids, params):
    emb = params["embedding"][ids].astype(jnp.float32)              # (S, B, D)
    S, B, _ = emb.shape
    H = params["w_hh_f"].shape[0]

    def lstm(xs, w_ih, w_hh, b):
        def step(carry, x):
            h, c = carry
            g = x @ w_ih + h @ w_hh + b
            i = jax.nn.sigmoid(g[:, :H])
            f = jax.nn.sigmoid(g[:, H:2 * H])
            gg = jnp.tanh(g[:, 2 * H:3 * H])
            o = jax.nn.sigmoid(g[:, 3 * H:])
            c = f * c + i * gg
            h = o * jnp.tanh(c)
            return (h, c), h
        (_, _), hs = lax.scan(step, (jnp.zeros((B, H)), jnp.zeros((B, H))), xs)
        return hs

    h_f = lstm(emb, params["w_ih_f"], params["w_hh_f"], params["b_f"])
    h_b = lstm(emb[::-1], params["w_ih_b"], params["w_hh_b"], params["b_b"])[::-1]
    bilstm_out = jnp.concatenate([h_f, h_b], axis=-1)               # (S, B, 2H)
    pooled = jnp.max(bilstm_out, axis=0)                            # (B, 2H)
    h2l = jnp.tanh(pooled) @ params["w_h2l"] + params["b_h2l"]
    gate = jax.nn.sigmoid(pooled @ params["w_gate"] + params["b_gate"])
    hw = h2l * gate + (1.0 - gate) * pooled
    return hw @ params["w_logit"] + params["b_logit"]


if __name__ == "__main__":
    # Small shapes consistent with the module's forward:
    #   seq S=8, batch B=2, vocab V=50, embed D=32, lstm hidden H=32, classes C=4
    S, B, V, D, H, C = 8, 2, 50, 32, 32, 4

    key = jax.random.PRNGKey(0)
    k_ids, k_params = jax.random.split(key)
    ids = jax.random.randint(k_ids, (S, B), 0, V, dtype=jnp.int32)
    params = init_params(k_params, V, D, H, C)

    logits = jax.block_until_ready(highway_bilstm_forward(ids, params))
    assert logits.shape == (B, C)

    ref = jax.block_until_ready(reference_forward(ids, params))
    max_err = float(jnp.max(jnp.abs(logits - ref)))
    assert max_err < 2e-2, f"mismatch vs reference: {max_err}"

    print("KERNEL_OK")
</pallas_src>

<mosaic_0001>
module attributes {stable_mosaic.version = 11 : i64} {
  func.func @highway_bilstm_kernel(%arg0: memref<64x32xf32, #tpu.memory_space<vmem>>, %arg1: memref<32x128xf32, #tpu.memory_space<vmem>>, %arg2: memref<32x128xf32, #tpu.memory_space<vmem>>, %arg3: memref<1x128xf32, #tpu.memory_space<vmem>>, %arg4: memref<32x128xf32, #tpu.memory_space<vmem>>, %arg5: memref<32x128xf32, #tpu.memory_space<vmem>>, %arg6: memref<1x128xf32, #tpu.memory_space<vmem>>, %arg7: memref<64x64xf32, #tpu.memory_space<vmem>>, %arg8: memref<1x64xf32, #tpu.memory_space<vmem>>, %arg9: memref<64x64xf32, #tpu.memory_space<vmem>>, %arg10: memref<1x64xf32, #tpu.memory_space<vmem>>, %arg11: memref<64x128xf32, #tpu.memory_space<vmem>>, %arg12: memref<1x128xf32, #tpu.memory_space<vmem>>, %arg13: memref<8x128xf32, #tpu.memory_space<vmem>>, %arg14: memref<8x8x128xf32, #tpu.memory_space<vmem>>, %arg15: memref<8x8x128xf32, #tpu.memory_space<vmem>>) attributes {dimension_semantics = [], scalar_prefetch = 0 : i64, scratch_operands = 2 : i64, tpu.core_type = #tpu.core_type<tc>} {
    %c0 = arith.constant 0 : index
    %c0_0 = arith.constant 0 : index
    %0 = vector.load %arg0[%c0, %c0_0] : memref<64x32xf32, #tpu.memory_space<vmem>>, vector<64x32xf32>
    %c0_1 = arith.constant 0 : index
    %c0_2 = arith.constant 0 : index
    %1 = vector.load %arg1[%c0_1, %c0_2] : memref<32x128xf32, #tpu.memory_space<vmem>>, vector<32x128xf32>
    %cst = arith.constant dense<0.000000e+00> : vector<64x128xf32>
    %2 = tpu.matmul %0, %1, %cst {dimension_numbers = #tpu.dot_dimension_numbers<[1], [0], [0], [1], [0, 0, 1, 1], [], []>} : vector<64x32xf32>, vector<32x128xf32>, vector<64x128xf32> -> vector<64x128xf32>
    %c0_3 = arith.constant 0 : index
    %c0_4 = arith.constant 0 : index
    %3 = vector.load %arg3[%c0_3, %c0_4] : memref<1x128xf32, #tpu.memory_space<vmem>>, vector<1x128xf32>
    %4 = vector.broadcast %3 : vector<1x128xf32> to vector<64x128xf32>
    %5 = arith.addf %2, %4 : vector<64x128xf32>
    %6 = vector.shape_cast %5 : vector<64x128xf32> to vector<8x8x128xf32>
    %c0_5 = arith.constant 0 : index
    %c0_6 = arith.constant 0 : index
    %c0_7 = arith.constant 0 : index
    %7 = vector.load %arg14[%c0_5, %c0_6, %c0_7] : memref<8x8x128xf32, #tpu.memory_space<vmem>>, vector<8x8x128xf32>
    tpu.vector_store %arg14[%c0_5, %c0_6, %c0_7], %6 {strides = array<i32>} : memref<8x8x128xf32, #tpu.memory_space<vmem>>, vector<8x8x128xf32>,
    %c0_8 = arith.constant 0 : index
    %c0_9 = arith.constant 0 : index
    %8 = vector.load %arg4[%c0_8, %c0_9] : memref<32x128xf32, #tpu.memory_space<vmem>>, vector<32x128xf32>
    %cst_10 = arith.constant dense<0.000000e+00> : vector<64x128xf32>
    %9 = tpu.matmul %0, %8, %cst_10 {dimension_numbers = #tpu.dot_dimension_numbers<[1], [0], [0], [1], [0, 0, 1, 1], [], []>} : vector<64x32xf32>, vector<32x128xf32>, vector<64x128xf32> -> vector<64x128xf32>
    %c0_11 = arith.constant 0 : index
    %c0_12 = arith.constant 0 : index
    %10 = vector.load %arg6[%c0_11, %c0_12] : memref<1x128xf32, #tpu.memory_space<vmem>>, vector<1x128xf32>
    %11 = vector.broadcast %10 : vector<1x128xf32> to vector<64x128xf32>
    %12 = arith.addf %9, %11 : vector<64x128xf32>
    %13 = vector.shape_cast %12 : vector<64x128xf32> to vector<8x8x128xf32>
    %c0_13 = arith.constant 0 : index
    %c0_14 = arith.constant 0 : index
    %c0_15 = arith.constant 0 : index
    %14 = vector.load %arg15[%c0_13, %c0_14, %c0_15] : memref<8x8x128xf32, #tpu.memory_space<vmem>>, vector<8x8x128xf32>
    tpu.vector_store %arg15[%c0_13, %c0_14, %c0_15], %13 {strides = array<i32>} : memref<8x8x128xf32, #tpu.memory_space<vmem>>, vector<8x8x128xf32>,
    %c0_16 = arith.constant 0 : index
    %c0_17 = arith.constant 0 : index
    %15 = vector.load %arg2[%c0_16, %c0_17] : memref<32x128xf32, #tpu.memory_space<vmem>>, vector<32x128xf32>
    %c0_18 = arith.constant 0 : index
    %c0_19 = arith.constant 0 : index
    %16 = vector.load %arg5[%c0_18, %c0_19] : memref<32x128xf32, #tpu.memory_space<vmem>>, vector<32x128xf32>
    %cst_20 = arith.constant 0.000000e+00 : f32
    %17 = vector.broadcast %cst_20 : f32 to vector<8x32xf32>
    %cst_21 = arith.constant 0xFF800000 : f32
    %18 = vector.broadcast %cst_21 : f32 to vector<8x32xf32>
    %c0_i32 = arith.constant 0 : i32
    %19 = arith.index_cast %c0_i32 : i32 to index
    %c0_22 = arith.constant 0 : index
    %c0_23 = arith.constant 0 : index
    %20 = vector.load %arg14[%19, %c0_22, %c0_23] : memref<8x8x128xf32, #tpu.memory_space<vmem>>, vector<1x8x128xf32>
    %21 = vector.shape_cast %20 : vector<1x8x128xf32> to vector<8x128xf32>
    %cst_24 = arith.constant dense<0.000000e+00> : vector<8x128xf32>
    %22 = tpu.matmul %17, %15, %cst_24 {dimension_numbers = #tpu.dot_dimension_numbers<[1], [0], [0], [1], [0, 0, 1, 1], [], []>} : vector<8x32xf32>, vector<32x128xf32>, vector<8x128xf32> -> vector<8x128xf32>
    %23 = arith.addf %21, %22 : vector<8x128xf32>
    %c7_i32 = arith.constant 7 : i32
    %24 = arith.subi %c7_i32, %c0_i32 : i32
    %25 = arith.index_cast %24 : i32 to index
    %c0_25 = arith.constant 0 : index
    %c0_26 = arith.constant 0 : index
    %26 = vector.load %arg15[%25, %c0_25, %c0_26] : memref<8x8x128xf32, #tpu.memory_space<vmem>>, vector<1x8x128xf32>
    %27 = vector.shape_cast %26 : vector<1x8x128xf32> to vector<8x128xf32>
    %cst_27 = arith.constant dense<0.000000e+00> : vector<8x128xf32>
    %28 = tpu.matmul %17, %16, %cst_27 {dimension_numbers = #tpu.dot_dimension_numbers<[1], [0], [0], [1], [0, 0, 1, 1], [], []>} : vector<8x32xf32>, vector<32x128xf32>, vector<8x128xf32> -> vector<8x128xf32>
    %29 = arith.addf %27, %28 : vector<8x128xf32>
    %30 = vector.extract_strided_slice %23 {offsets = [0, 0], sizes = [8, 32], strides = [1, 1]} : vector<8x128xf32> to vector<8x32xf32>
    %31 = arith.negf %30 : vector<8x32xf32>
    %32 = math.exp %31 : vector<8x32xf32>
    %cst_28 = arith.constant 1.000000e+00 : f32
    %33 = vector.broadcast %cst_28 : f32 to vector<8x32xf32>
    %34 = arith.addf %33, %32 : vector<8x32xf32>
    %35 = arith.divf %33, %34 : vector<8x32xf32>
    %36 = vector.extract_strided_slice %23 {offsets = [0, 32], sizes = [8, 32], strides = [1, 1]} : vector<8x128xf32> to vector<8x32xf32>
    %37 = arith.negf %36 : vector<8x32xf32>
    %38 = math.exp %37 : vector<8x32xf32>
    %cst_29 = arith.constant 1.000000e+00 : f32
    %39 = vector.broadcast %cst_29 : f32 to vector<8x32xf32>
    %40 = arith.addf %39, %38 : vector<8x32xf32>
    %41 = arith.divf %39, %40 : vector<8x32xf32>
    %42 = vector.extract_strided_slice %23 {offsets = [0, 64], sizes = [8, 32], strides = [1, 1]} : vector<8x128xf32> to vector<8x32xf32>
    %43 = math.tanh %42 : vector<8x32xf32>
    %44 = vector.extract_strided_slice %23 {offsets = [0, 96], sizes = [8, 32], strides = [1, 1]} : vector<8x128xf32> to vector<8x32xf32>
    %45 = arith.negf %44 : vector<8x32xf32>
    %46 = math.exp %45 : vector<8x32xf32>
    %cst_30 = arith.constant 1.000000e+00 : f32
    %47 = vector.broadcast %cst_30 : f32 to vector<8x32xf32>
    %48 = arith.addf %47, %46 : vector<8x32xf32>
    %49 = arith.divf %47, %48 : vector<8x32xf32>
    %50 = arith.mulf %41, %17 : vector<8x32xf32>
    %51 = arith.mulf %35, %43 : vector<8x32xf32>
    %52 = arith.addf %50, %51 : vector<8x32xf32>
    %53 = math.tanh %52 : vector<8x32xf32>
    %54 = arith.mulf %49, %53 : vector<8x32xf32>
    %55 = vector.extract_strided_slice %29 {offsets = [0, 0], sizes = [8, 32], strides = [1, 1]} : vector<8x128xf32> to vector<8x32xf32>
    %56 = arith.negf %55 : vector<8x32xf32>
    %57 = math.exp %56 : vector<8x32xf32>
    %cst_31 = arith.constant 1.000000e+00 : f32
    %58 = vector.broadcast %cst_31 : f32 to vector<8x32xf32>
    %59 = arith.addf %58, %57 : vector<8x32xf32>
    %60 = arith.divf %58, %59 : vector<8x32xf32>
    %61 = vector.extract_strided_slice %29 {offsets = [0, 32], sizes = [8, 32], strides = [1, 1]} : vector<8x128xf32> to vector<8x32xf32>
    %62 = arith.negf %61 : vector<8x32xf32>
    %63 = math.exp %62 : vector<8x32xf32>
    %cst_32 = arith.constant 1.000000e+00 : f32
    %64 = vector.broadcast %cst_32 : f32 to vector<8x32xf32>
    %65 = arith.addf %64, %63 : vector<8x32xf32>
    %66 = arith.divf %64, %65 : vector<8x32xf32>
    %67 = vector.extract_strided_slice %29 {offsets = [0, 64], sizes = [8, 32], strides = [1, 1]} : vector<8x128xf32> to vector<8x32xf32>
    %68 = math.tanh %67 : vector<8x32xf32>
    %69 = vector.extract_strided_slice %29 {offsets = [0, 96], sizes = [8, 32], strides = [1, 1]} : vector<8x128xf32> to vector<8x32xf32>
    %70 = arith.negf %69 : vector<8x32xf32>
    %71 = math.exp %70 : vector<8x32xf32>
    %cst_33 = arith.constant 1.000000e+00 : f32
    %72 = vector.broadcast %cst_33 : f32 to vector<8x32xf32>
    %73 = arith.addf %72, %71 : vector<8x32xf32>
    %74 = arith.divf %72, %73 : vector<8x32xf32>
    %75 = arith.mulf %66, %17 : vector<8x32xf32>
    %76 = arith.mulf %60, %68 : vector<8x32xf32>
    %77 = arith.addf %75, %76 : vector<8x32xf32>
    %78 = math.tanh %77 : vector<8x32xf32>
    %79 = arith.mulf %74, %78 : vector<8x32xf32>
    %80 = arith.maximumf %18, %54 : vector<8x32xf32>
    %81 = arith.maximumf %18, %79 : vector<8x32xf32>
    %c1_i32 = arith.constant 1 : i32
    %82 = arith.index_cast %c1_i32 : i32 to index
    %c0_34 = arith.constant 0 : index
    %c0_35 = arith.constant 0 : index
    %83 = vector.load %arg14[%82, %c0_34, %c0_35] : memref<8x8x128xf32, #tpu.memory_space<vmem>>, vector<1x8x128xf32>
    %84 = vector.shape_cast %83 : vector<1x8x128xf32> to vector<8x128xf32>
    %cst_36 = arith.constant dense<0.000000e+00> : vector<8x128xf32>
    %85 = tpu.matmul %54, %15, %cst_36 {dimension_numbers = #tpu.dot_dimension_numbers<[1], [0], [0], [1], [0, 0, 1, 1], [], []>} : vector<8x32xf32>, vector<32x128xf32>, vector<8x128xf32> -> vector<8x128xf32>
    %86 = arith.addf %84, %85 : vector<8x128xf32>
    %c7_i32_37 = arith.constant 7 : i32
    %87 = arith.subi %c7_i32_37, %c1_i32 : i32
    %88 = arith.index_cast %87 : i32 to index
    %c0_38 = arith.constant 0 : index
    %c0_39 = arith.constant 0 : index
    %89 = vector.load %arg15[%88, %c0_38, %c0_39] : memref<8x8x128xf32, #tpu.memory_space<vmem>>, vector<1x8x128xf32>
    %90 = vector.shape_cast %89 : vector<1x8x128xf32> to vector<8x128xf32>
    %cst_40 = arith.constant dense<0.000000e+00> : vector<8x128xf32>
    %91 = tpu.matmul %79, %16, %cst_40 {dimension_numbers = #tpu.dot_dimension_numbers<[1], [0], [0], [1], [0, 0, 1, 1], [], []>} : vector<8x32xf32>, vector<32x128xf32>, vector<8x128xf32> -> vector<8x128xf32>
    %92 = arith.addf %90, %91 : vector<8x128xf32>
    %93 = vector.extract_strided_slice %86 {offsets = [0, 0], sizes = [8, 32], strides = [1, 1]} : vector<8x128xf32> to vector<8x32xf32>
    %94 = arith.negf %93 : vector<8x32xf32>
    %95 = math.exp %94 : vector<8x32xf32>
    %cst_41 = arith.constant 1.000000e+00 : f32
    %96 = vector.broadcast %cst_41 : f32 to vector<8x32xf32>
    %97 = arith.addf %96, %95 : vector<8x32xf32>
    %98 = arith.divf %96, %97 : vector<8x32xf32>
    %99 = vector.extract_strided_slice %86 {offsets = [0, 32], sizes = [8, 32], strides = [1, 1]} : vector<8x128xf32> to vector<8x32xf32>
    %100 = arith.negf %99 : vector<8x32xf32>
    %101 = math.exp %100 : vector<8x32xf32>
    %cst_42 = arith.constant 1.000000e+00 : f32
    %102 = vector.broadcast %cst_42 : f32 to vector<8x32xf32>
    %103 = arith.addf %102, %101 : vector<8x32xf32>
    %104 = arith.divf %102, %103 : vector<8x32xf32>
    %105 = vector.extract_strided_slice %86 {offsets = [0, 64], sizes = [8, 32], strides = [1, 1]} : vector<8x128xf32> to vector<8x32xf32>
    %106 = math.tanh %105 : vector<8x32xf32>
    %107 = vector.extract_strided_slice %86 {offsets = [0, 96], sizes = [8, 32], strides = [1, 1]} : vector<8x128xf32> to vector<8x32xf32>
    %108 = arith.negf %107 : vector<8x32xf32>
    %109 = math.exp %108 : vector<8x32xf32>
    %cst_43 = arith.constant 1.000000e+00 : f32
    %110 = vector.broadcast %cst_43 : f32 to vector<8x32xf32>
    %111 = arith.addf %110, %109 : vector<8x32xf32>
    %112 = arith.divf %110, %111 : vector<8x32xf32>
    %113 = arith.mulf %104, %52 : vector<8x32xf32>
    %114 = arith.mulf %98, %106 : vector<8x32xf32>
    %115 = arith.addf %113, %114 : vector<8x32xf32>
    %116 = math.tanh %115 : vector<8x32xf32>
    %117 = arith.mulf %112, %116 : vector<8x32xf32>
    %118 = vector.extract_strided_slice %92 {offsets = [0, 0], sizes = [8, 32], strides = [1, 1]} : vector<8x128xf32> to vector<8x32xf32>
    %119 = arith.negf %118 : vector<8x32xf32>
    %120 = math.exp %119 : vector<8x32xf32>
    %cst_44 = arith.constant 1.000000e+00 : f32
    %121 = vector.broadcast %cst_44 : f32 to vector<8x32xf32>
    %122 = arith.addf %121, %120 : vector<8x32xf32>
    %123 = arith.divf %121, %122 : vector<8x32xf32>
    %124 = vector.extract_strided_slice %92 {offsets = [0, 32], sizes = [8, 32], strides = [1, 1]} : vector<8x128xf32> to vector<8x32xf32>
    %125 = arith.negf %124 : vector<8x32xf32>
    %126 = math.exp %125 : vector<8x32xf32>
    %cst_45 = arith.constant 1.000000e+00 : f32
    %127 = vector.broadcast %cst_45 : f32 to vector<8x32xf32>
    %128 = arith.addf %127, %126 : vector<8x32xf32>
    %129 = arith.divf %127, %128 : vector<8x32xf32>
    %130 = vector.extract_strided_slice %92 {offsets = [0, 64], sizes = [8, 32], strides = [1, 1]} : vector<8x128xf32> to vector<8x32xf32>
    %131 = math.tanh %130 : vector<8x32xf32>
    %132 = vector.extract_strided_slice %92 {offsets = [0, 96], sizes = [8, 32], strides = [1, 1]} : vector<8x128xf32> to vector<8x32xf32>
    %133 = arith.negf %132 : vector<8x32xf32>
    %134 = math.exp %133 : vector<8x32xf32>
    %cst_46 = arith.constant 1.000000e+00 : f32
    %135 = vector.broadcast %cst_46 : f32 to vector<8x32xf32>
    %136 = arith.addf %135, %134 : vector<8x32xf32>
    %137 = arith.divf %135, %136 : vector<8x32xf32>
    %138 = arith.mulf %129, %77 : vector<8x32xf32>
    %139 = arith.mulf %123, %131 : vector<8x32xf32>
    %140 = arith.addf %138, %139 : vector<8x32xf32>
    %141 = math.tanh %140 : vector<8x32xf32>
    %142 = arith.mulf %137, %141 : vector<8x32xf32>
    %143 = arith.maximumf %80, %117 : vector<8x32xf32>
    %144 = arith.maximumf %81, %142 : vector<8x32xf32>
    %c2_i32 = arith.constant 2 : i32
    %145 = arith.index_cast %c2_i32 : i32 to index
    %c0_47 = arith.constant 0 : index
    %c0_48 = arith.constant 0 : index
    %146 = vector.load %arg14[%145, %c0_47, %c0_48] : memref<8x8x128xf32, #tpu.memory_space<vmem>>, vector<1x8x128xf32>
    %147 = vector.shape_cast %146 : vector<1x8x128xf32> to vector<8x128xf32>
    %cst_49 = arith.constant dense<0.000000e+00> : vector<8x128xf32>
    %148 = tpu.matmul %117, %15, %cst_49 {dimension_numbers = #tpu.dot_dimension_numbers<[1], [0], [0], [1], [0, 0, 1, 1], [], []>} : vector<8x32xf32>, vector<32x128xf32>, vector<8x128xf32> -> vector<8x128xf32>
    %149 = arith.addf %147, %148 : vector<8x128xf32>
    %c7_i32_50 = arith.constant 7 : i32
    %150 = arith.subi %c7_i32_50, %c2_i32 : i32
    %151 = arith.index_cast %150 : i32 to index
    %c0_51 = arith.constant 0 : index
    %c0_52 = arith.constant 0 : index
    %152 = vector.load %arg15[%151, %c0_51, %c0_52] : memref<8x8x128xf32, #tpu.memory_space<vmem>>, vector<1x8x128xf32>
    %153 = vector.shape_cast %152 : vector<1x8x128xf32> to vector<8x128xf32>
    %cst_53 = arith.constant dense<0.000000e+00> : vector<8x128xf32>
    %154 = tpu.matmul %142, %16, %cst_53 {dimension_numbers = #tpu.dot_dimension_numbers<[1], [0], [0], [1], [0, 0, 1, 1], [], []>} : vector<8x32xf32>, vector<32x128xf32>, vector<8x128xf32> -> vector<8x128xf32>
    %155 = arith.addf %153, %154 : vector<8x128xf32>
    %156 = vector.extract_strided_slice %149 {offsets = [0, 0], sizes = [8, 32], strides = [1, 1]} : vector<8x128xf32> to vector<8x32xf32>
    %157 = arith.negf %156 : vector<8x32xf32>
    %158 = math.exp %157 : vector<8x32xf32>
    %cst_54 = arith.constant 1.000000e+00 : f32
    %159 = vector.broadcast %cst_54 : f32 to vector<8x32xf32>
    %160 = arith.addf %159, %158 : vector<8x32xf32>
    %161 = arith.divf %159, %160 : vector<8x32xf32>
    %162 = vector.extract_strided_slice %149 {offsets = [0, 32], sizes = [8, 32], strides = [1, 1]} : vector<8x128xf32> to vector<8x32xf32>
    %163 = arith.negf %162 : vector<8x32xf32>
    %164 = math.exp %163 : vector<8x32xf32>
    %cst_55 = arith.constant 1.000000e+00 : f32
    %165 = vector.broadcast %cst_55 : f32 to vector<8x32xf32>
    %166 = arith.addf %165, %164 : vector<8x32xf32>
    %167 = arith.divf %165, %166 : vector<8x32xf32>
    %168 = vector.extract_strided_slice %149 {offsets = [0, 64], sizes = [8, 32], strides = [1, 1]} : vector<8x128xf32> to vector<8x32xf32>
    %169 = math.tanh %168 : vector<8x32xf32>
    %170 = vector.extract_strided_slice %149 {offsets = [0, 96], sizes = [8, 32], strides = [1, 1]} : vector<8x128xf32> to vector<8x32xf32>
    %171 = arith.negf %170 : vector<8x32xf32>
    %172 = math.exp %171 : vector<8x32xf32>
    %cst_56 = arith.constant 1.000000e+00 : f32
    %173 = vector.broadcast %cst_56 : f32 to vector<8x32xf32>
    %174 = arith.addf %173, %172 : vector<8x32xf32>
    %175 = arith.divf %173, %174 : vector<8x32xf32>
    %176 = arith.mulf %167, %115 : vector<8x32xf32>
    %177 = arith.mulf %161, %169 : vector<8x32xf32>
    %178 = arith.addf %176, %177 : vector<8x32xf32>
    %179 = math.tanh %178 : vector<8x32xf32>
    %180 = arith.mulf %175, %179 : vector<8x32xf32>
    %181 = vector.extract_strided_slice %155 {offsets = [0, 0], sizes = [8, 32], strides = [1, 1]} : vector<8x128xf32> to vector<8x32xf32>
    %182 = arith.negf %181 : vector<8x32xf32>
    %183 = math.exp %182 : vector<8x32xf32>
    %cst_57 = arith.constant 1.000000e+00 : f32
    %184 = vector.broadcast %cst_57 : f32 to vector<8x32xf32>
    %185 = arith.addf %184, %183 : vector<8x32xf32>
    %186 = arith.divf %184, %185 : vector<8x32xf32>
    %187 = vector.extract_strided_slice %155 {offsets = [0, 32], sizes = [8, 32], strides = [1, 1]} : vector<8x128xf32> to vector<8x32xf32>
    %188 = arith.negf %187 : vector<8x32xf32>
    %189 = math.exp %188 : vector<8x32xf32>
    %cst_58 = arith.constant 1.000000e+00 : f32
    %190 = vector.broadcast %cst_58 : f32 to vector<8x32xf32>
    %191 = arith.addf %190, %189 : vector<8x32xf32>
    %192 = arith.divf %190, %191 : vector<8x32xf32>
    %193 = vector.extract_strided_slice %155 {offsets = [0, 64], sizes = [8, 32], strides = [1, 1]} : vector<8x128xf32> to vector<8x32xf32>
    %194 = math.tanh %193 : vector<8x32xf32>
    %195 = vector.extract_strided_slice %155 {offsets = [0, 96], sizes = [8, 32], strides = [1, 1]} : vector<8x128xf32> to vector<8x32xf32>
    %196 = arith.negf %195 : vector<8x32xf32>
    %197 = math.exp %196 : vector<8x32xf32>
    %cst_59 = arith.constant 1.000000e+00 : f32
    %198 = vector.broadcast %cst_59 : f32 to vector<8x32xf32>
    %199 = arith.addf %198, %197 : vector<8x32xf32>
    %200 = arith.divf %198, %199 : vector<8x32xf32>
    %201 = arith.mulf %192, %140 : vector<8x32xf32>
    %202 = arith.mulf %186, %194 : vector<8x32xf32>
    %203 = arith.addf %201, %202 : vector<8x32xf32>
    %204 = math.tanh %203 : vector<8x32xf32>
    %205 = arith.mulf %200, %204 : vector<8x32xf32>
    %206 = arith.maximumf %143, %180 : vector<8x32xf32>
    %207 = arith.maximumf %144, %205 : vector<8x32xf32>
    %c3_i32 = arith.constant 3 : i32
    %208 = arith.index_cast %c3_i32 : i32 to index
    %c0_60 = arith.constant 0 : index
    %c0_61 = arith.constant 0 : index
    %209 = vector.load %arg14[%208, %c0_60, %c0_61] : memref<8x8x128xf32, #tpu.memory_space<vmem>>, vector<1x8x128xf32>
    %210 = vector.shape_cast %209 : vector<1x8x128xf32> to vector<8x128xf32>
    %cst_62 = arith.constant dense<0.000000e+00> : vector<8x128xf32>
    %211 = tpu.matmul %180, %15, %cst_62 {dimension_numbers = #tpu.dot_dimension_numbers<[1], [0], [0], [1], [0, 0, 1, 1], [], []>} : vector<8x32xf32>, vector<32x128xf32>, vector<8x128xf32> -> vector<8x128xf32>
    %212 = arith.addf %210, %211 : vector<8x128xf32>
    %c7_i32_63 = arith.constant 7 : i32
    %213 = arith.subi %c7_i32_63, %c3_i32 : i32
    %214 = arith.index_cast %213 : i32 to index
    %c0_64 = arith.constant 0 : index
    %c0_65 = arith.constant 0 : index
    %215 = vector.load %arg15[%214, %c0_64, %c0_65] : memref<8x8x128xf32, #tpu.memory_space<vmem>>, vector<1x8x128xf32>
    %216 = vector.shape_cast %215 : vector<1x8x128xf32> to vector<8x128xf32>
    %cst_66 = arith.constant dense<0.000000e+00> : vector<8x128xf32>
    %217 = tpu.matmul %205, %16, %cst_66 {dimension_numbers = #tpu.dot_dimension_numbers<[1], [0], [0], [1], [0, 0, 1, 1], [], []>} : vector<8x32xf32>, vector<32x128xf32>, vector<8x128xf32> -> vector<8x128xf32>
    %218 = arith.addf %216, %217 : vector<8x128xf32>
    %219 = vector.extract_strided_slice %212 {offsets = [0, 0], sizes = [8, 32], strides = [1, 1]} : vector<8x128xf32> to vector<8x32xf32>
    %220 = arith.negf %219 : vector<8x32xf32>
    %221 = math.exp %220 : vector<8x32xf32>
    %cst_67 = arith.constant 1.000000e+00 : f32
    %222 = vector.broadcast %cst_67 : f32 to vector<8x32xf32>
    %223 = arith.addf %222, %221 : vector<8x32xf32>
    %224 = arith.divf %222, %223 : vector<8x32xf32>
    %225 = vector.extract_strided_slice %212 {offsets = [0, 32], sizes = [8, 32], strides = [1, 1]} : vector<8x128xf32> to vector<8x32xf32>
    %226 = arith.negf %225 : vector<8x32xf32>
    %227 = math.exp %226 : vector<8x32xf32>
    %cst_68 = arith.constant 1.000000e+00 : f32
    %228 = vector.broadcast %cst_68 : f32 to vector<8x32xf32>
    %229 = arith.addf %228, %227 : vector<8x32xf32>
    %230 = arith.divf %228, %229 : vector<8x32xf32>
    %231 = vector.extract_strided_slice %212 {offsets = [0, 64], sizes = [8, 32], strides = [1, 1]} : vector<8x128xf32> to vector<8x32xf32>
    %232 = math.tanh %231 : vector<8x32xf32>
    %233 = vector.extract_strided_slice %212 {offsets = [0, 96], sizes = [8, 32], strides = [1, 1]} : vector<8x128xf32> to vector<8x32xf32>
    %234 = arith.negf %233 : vector<8x32xf32>
    %235 = math.exp %234 : vector<8x32xf32>
    %cst_69 = arith.constant 1.000000e+00 : f32
    %236 = vector.broadcast %cst_69 : f32 to vector<8x32xf32>
    %237 = arith.addf %236, %235 : vector<8x32xf32>
    %238 = arith.divf %236, %237 : vector<8x32xf32>
    %239 = arith.mulf %230, %178 : vector<8x32xf32>
    %240 = arith.mulf %224, %232 : vector<8x32xf32>
    %241 = arith.addf %239, %240 : vector<8x32xf32>
    %242 = math.tanh %241 : vector<8x32xf32>
    %243 = arith.mulf %238, %242 : vector<8x32xf32>
    %244 = vector.extract_strided_slice %218 {offsets = [0, 0], sizes = [8, 32], strides = [1, 1]} : vector<8x128xf32> to vector<8x32xf32>
    %245 = arith.negf %244 : vector<8x32xf32>
    %246 = math.exp %245 : vector<8x32xf32>
    %cst_70 = arith.constant 1.000000e+00 : f32
    %247 = vector.broadcast %cst_70 : f32 to vector<8x32xf32>
    %248 = arith.addf %247, %246 : vector<8x32xf32>
    %249 = arith.divf %247, %248 : vector<8x32xf32>
    %250 = vector.extract_strided_slice %218 {offsets = [0, 32], sizes = [8, 32], strides = [1, 1]} : vector<8x128xf32> to vector<8x32xf32>
    %251 = arith.negf %250 : vector<8x32xf32>
    %252 = math.exp %251 : vector<8x32xf32>
    %cst_71 = arith.constant 1.000000e+00 : f32
    %253 = vector.broadcast %cst_71 : f32 to vector<8x32xf32>
    %254 = arith.addf %253, %252 : vector<8x32xf32>
    %255 = arith.divf %253, %254 : vector<8x32xf32>
    %256 = vector.extract_strided_slice %218 {offsets = [0, 64], sizes = [8, 32], strides = [1, 1]} : vector<8x128xf32> to vector<8x32xf32>
    %257 = math.tanh %256 : vector<8x32xf32>
    %258 = vector.extract_strided_slice %218 {offsets = [0, 96], sizes = [8, 32], strides = [1, 1]} : vector<8x128xf32> to vector<8x32xf32>
    %259 = arith.negf %258 : vector<8x32xf32>
    %260 = math.exp %259 : vector<8x32xf32>
    %cst_72 = arith.constant 1.000000e+00 : f32
    %261 = vector.broadcast %cst_72 : f32 to vector<8x32xf32>
    %262 = arith.addf %261, %260 : vector<8x32xf32>
    %263 = arith.divf %261, %262 : vector<8x32xf32>
    %264 = arith.mulf %255, %203 : vector<8x32xf32>
    %265 = arith.mulf %249, %257 : vector<8x32xf32>
    %266 = arith.addf %264, %265 : vector<8x32xf32>
    %267 = math.tanh %266 : vector<8x32xf32>
    %268 = arith.mulf %263, %267 : vector<8x32xf32>
    %269 = arith.maximumf %206, %243 : vector<8x32xf32>
    %270 = arith.maximumf %207, %268 : vector<8x32xf32>
    %c4_i32 = arith.constant 4 : i32
    %271 = arith.index_cast %c4_i32 : i32 to index
    %c0_73 = arith.constant 0 : index
    %c0_74 = arith.constant 0 : index
    %272 = vector.load %arg14[%271, %c0_73, %c0_74] : memref<8x8x128xf32, #tpu.memory_space<vmem>>, vector<1x8x128xf32>
    %273 = vector.shape_cast %272 : vector<1x8x128xf32> to vector<8x128xf32>
    %cst_75 = arith.constant dense<0.000000e+00> : vector<8x128xf32>
    %274 = tpu.matmul %243, %15, %cst_75 {dimension_numbers = #tpu.dot_dimension_numbers<[1], [0], [0], [1], [0, 0, 1, 1], [], []>} : vector<8x32xf32>, vector<32x128xf32>, vector<8x128xf32> -> vector<8x128xf32>
    %275 = arith.addf %273, %274 : vector<8x128xf32>
    %c7_i32_76 = arith.constant 7 : i32
    %276 = arith.subi %c7_i32_76, %c4_i32 : i32
    %277 = arith.index_cast %276 : i32 to index
    %c0_77 = arith.constant 0 : index
    %c0_78 = arith.constant 0 : index
    %278 = vector.load %arg15[%277, %c0_77, %c0_78] : memref<8x8x128xf32, #tpu.memory_space<vmem>>, vector<1x8x128xf32>
    %279 = vector.shape_cast %278 : vector<1x8x128xf32> to vector<8x128xf32>
    %cst_79 = arith.constant dense<0.000000e+00> : vector<8x128xf32>
    %280 = tpu.matmul %268, %16, %cst_79 {dimension_numbers = #tpu.dot_dimension_numbers<[1], [0], [0], [1], [0, 0, 1, 1], [], []>} : vector<8x32xf32>, vector<32x128xf32>, vector<8x128xf32> -> vector<8x128xf32>
    %281 = arith.addf %279, %280 : vector<8x128xf32>
    %282 = vector.extract_strided_slice %275 {offsets = [0, 0], sizes = [8, 32], strides = [1, 1]} : vector<8x128xf32> to vector<8x32xf32>
    %283 = arith.negf %282 : vector<8x32xf32>
    %284 = math.exp %283 : vector<8x32xf32>
    %cst_80 = arith.constant 1.000000e+00 : f32
    %285 = vector.broadcast %cst_80 : f32 to vector<8x32xf32>
    %286 = arith.addf %285, %284 : vector<8x32xf32>
    %287 = arith.divf %285, %286 : vector<8x32xf32>
    %288 = vector.extract_strided_slice %275 {offsets = [0, 32], sizes = [8, 32], strides = [1, 1]} : vector<8x128xf32> to vector<8x32xf32>
    %289 = arith.negf %288 : vector<8x32xf32>
    %290 = math.exp %289 : vector<8x32xf32>
    %cst_81 = arith.constant 1.000000e+00 : f32
    %291 = vector.broadcast %cst_81 : f32 to vector<8x32xf32>
    %292 = arith.addf %291, %290 : vector<8x32xf32>
    %293 = arith.divf %291, %292 : vector<8x32xf32>
    %294 = vector.extract_strided_slice %275 {offsets = [0, 64], sizes = [8, 32], strides = [1, 1]} : vector<8x128xf32> to vector<8x32xf32>
    %295 = math.tanh %294 : vector<8x32xf32>
    %296 = vector.extract_strided_slice %275 {offsets = [0, 96], sizes = [8, 32], strides = [1, 1]} : vector<8x128xf32> to vector<8x32xf32>
    %297 = arith.negf %296 : vector<8x32xf32>
    %298 = math.exp %297 : vector<8x32xf32>
    %cst_82 = arith.constant 1.000000e+00 : f32
    %299 = vector.broadcast %cst_82 : f32 to vector<8x32xf32>
    %300 = arith.addf %299, %298 : vector<8x32xf32>
    %301 = arith.divf %299, %300 : vector<8x32xf32>
    %302 = arith.mulf %293, %241 : vector<8x32xf32>
    %303 = arith.mulf %287, %295 : vector<8x32xf32>
    %304 = arith.addf %302, %303 : vector<8x32xf32>
    %305 = math.tanh %304 : vector<8x32xf32>
    %306 = arith.mulf %301, %305 : vector<8x32xf32>
    %307 = vector.extract_strided_slice %281 {offsets = [0, 0], sizes = [8, 32], strides = [1, 1]} : vector<8x128xf32> to vector<8x32xf32>
    %308 = arith.negf %307 : vector<8x32xf32>
    %309 = math.exp %308 : vector<8x32xf32>
    %cst_83 = arith.constant 1.000000e+00 : f32
    %310 = vector.broadcast %cst_83 : f32 to vector<8x32xf32>
    %311 = arith.addf %310, %309 : vector<8x32xf32>
    %312 = arith.divf %310, %311 : vector<8x32xf32>
    %313 = vector.extract_strided_slice %281 {offsets = [0, 32], sizes = [8, 32], strides = [1, 1]} : vector<8x128xf32> to vector<8x32xf32>
    %314 = arith.negf %313 : vector<8x32xf32>
    %315 = math.exp %314 : vector<8x32xf32>
    %cst_84 = arith.constant 1.000000e+00 : f32
    %316 = vector.broadcast %cst_84 : f32 to vector<8x32xf32>
    %317 = arith.addf %316, %315 : vector<8x32xf32>
    %318 = arith.divf %316, %317 : vector<8x32xf32>
    %319 = vector.extract_strided_slice %281 {offsets = [0, 64], sizes = [8, 32], strides = [1, 1]} : vector<8x128xf32> to vector<8x32xf32>
    %320 = math.tanh %319 : vector<8x32xf32>
    %321 = vector.extract_strided_slice %281 {offsets = [0, 96], sizes = [8, 32], strides = [1, 1]} : vector<8x128xf32> to vector<8x32xf32>
    %322 = arith.negf %321 : vector<8x32xf32>
    %323 = math.exp %322 : vector<8x32xf32>
    %cst_85 = arith.constant 1.000000e+00 : f32
    %324 = vector.broadcast %cst_85 : f32 to vector<8x32xf32>
    %325 = arith.addf %324, %323 : vector<8x32xf32>
    %326 = arith.divf %324, %325 : vector<8x32xf32>
    %327 = arith.mulf %318, %266 : vector<8x32xf32>
    %328 = arith.mulf %312, %320 : vector<8x32xf32>
    %329 = arith.addf %327, %328 : vector<8x32xf32>
    %330 = math.tanh %329 : vector<8x32xf32>
    %331 = arith.mulf %326, %330 : vector<8x32xf32>
    %332 = arith.maximumf %269, %306 : vector<8x32xf32>
    %333 = arith.maximumf %270, %331 : vector<8x32xf32>
    %c5_i32 = arith.constant 5 : i32
    %334 = arith.index_cast %c5_i32 : i32 to index
    %c0_86 = arith.constant 0 : index
    %c0_87 = arith.constant 0 : index
    %335 = vector.load %arg14[%334, %c0_86, %c0_87] : memref<8x8x128xf32, #tpu.memory_space<vmem>>, vector<1x8x128xf32>
    %336 = vector.shape_cast %335 : vector<1x8x128xf32> to vector<8x128xf32>
    %cst_88 = arith.constant dense<0.000000e+00> : vector<8x128xf32>
    %337 = tpu.matmul %306, %15, %cst_88 {dimension_numbers = #tpu.dot_dimension_numbers<[1], [0], [0], [1], [0, 0, 1, 1], [], []>} : vector<8x32xf32>, vector<32x128xf32>, vector<8x128xf32> -> vector<8x128xf32>
    %338 = arith.addf %336, %337 : vector<8x128xf32>
    %c7_i32_89 = arith.constant 7 : i32
    %339 = arith.subi %c7_i32_89, %c5_i32 : i32
    %340 = arith.index_cast %339 : i32 to index
    %c0_90 = arith.constant 0 : index
    %c0_91 = arith.constant 0 : index
    %341 = vector.load %arg15[%340, %c0_90, %c0_91] : memref<8x8x128xf32, #tpu.memory_space<vmem>>, vector<1x8x128xf32>
    %342 = vector.shape_cast %341 : vector<1x8x128xf32> to vector<8x128xf32>
    %cst_92 = arith.constant dense<0.000000e+00> : vector<8x128xf32>
    %343 = tpu.matmul %331, %16, %cst_92 {dimension_numbers = #tpu.dot_dimension_numbers<[1], [0], [0], [1], [0, 0, 1, 1], [], []>} : vector<8x32xf32>, vector<32x128xf32>, vector<8x128xf32> -> vector<8x128xf32>
    %344 = arith.addf %342, %343 : vector<8x128xf32>
    %345 = vector.extract_strided_slice %338 {offsets = [0, 0], sizes = [8, 32], strides = [1, 1]} : vector<8x128xf32> to vector<8x32xf32>
    %346 = arith.negf %345 : vector<8x32xf32>
    %347 = math.exp %346 : vector<8x32xf32>
    %cst_93 = arith.constant 1.000000e+00 : f32
    %348 = vector.broadcast %cst_93 : f32 to vector<8x32xf32>
    %349 = arith.addf %348, %347 : vector<8x32xf32>
    %350 = arith.divf %348, %349 : vector<8x32xf32>
    %351 = vector.extract_strided_slice %338 {offsets = [0, 32], sizes = [8, 32], strides = [1, 1]} : vector<8x128xf32> to vector<8x32xf32>
    %352 = arith.negf %351 : vector<8x32xf32>
    %353 = math.exp %352 : vector<8x32xf32>
    %cst_94 = arith.constant 1.000000e+00 : f32
    %354 = vector.broadcast %cst_94 : f32 to vector<8x32xf32>
    %355 = arith.addf %354, %353 : vector<8x32xf32>
    %356 = arith.divf %354, %355 : vector<8x32xf32>
    %357 = vector.extract_strided_slice %338 {offsets = [0, 64], sizes = [8, 32], strides = [1, 1]} : vector<8x128xf32> to vector<8x32xf32>
    %358 = math.tanh %357 : vector<8x32xf32>
    %359 = vector.extract_strided_slice %338 {offsets = [0, 96], sizes = [8, 32], strides = [1, 1]} : vector<8x128xf32> to vector<8x32xf32>
    %360 = arith.negf %359 : vector<8x32xf32>
    %361 = math.exp %360 : vector<8x32xf32>
    %cst_95 = arith.constant 1.000000e+00 : f32
    %362 = vector.broadcast %cst_95 : f32 to vector<8x32xf32>
    %363 = arith.addf %362, %361 : vector<8x32xf32>
    %364 = arith.divf %362, %363 : vector<8x32xf32>
    %365 = arith.mulf %356, %304 : vector<8x32xf32>
    %366 = arith.mulf %350, %358 : vector<8x32xf32>
    %367 = arith.addf %365, %366 : vector<8x32xf32>
    %368 = math.tanh %367 : vector<8x32xf32>
    %369 = arith.mulf %364, %368 : vector<8x32xf32>
    %370 = vector.extract_strided_slice %344 {offsets = [0, 0], sizes = [8, 32], strides = [1, 1]} : vector<8x128xf32> to vector<8x32xf32>
    %371 = arith.negf %370 : vector<8x32xf32>
    %372 = math.exp %371 : vector<8x32xf32>
    %cst_96 = arith.constant 1.000000e+00 : f32
    %373 = vector.broadcast %cst_96 : f32 to vector<8x32xf32>
    %374 = arith.addf %373, %372 : vector<8x32xf32>
    %375 = arith.divf %373, %374 : vector<8x32xf32>
    %376 = vector.extract_strided_slice %344 {offsets = [0, 32], sizes = [8, 32], strides = [1, 1]} : vector<8x128xf32> to vector<8x32xf32>
    %377 = arith.negf %376 : vector<8x32xf32>
    %378 = math.exp %377 : vector<8x32xf32>
    %cst_97 = arith.constant 1.000000e+00 : f32
    %379 = vector.broadcast %cst_97 : f32 to vector<8x32xf32>
    %380 = arith.addf %379, %378 : vector<8x32xf32>
    %381 = arith.divf %379, %380 : vector<8x32xf32>
    %382 = vector.extract_strided_slice %344 {offsets = [0, 64], sizes = [8, 32], strides = [1, 1]} : vector<8x128xf32> to vector<8x32xf32>
    %383 = math.tanh %382 : vector<8x32xf32>
    %384 = vector.extract_strided_slice %344 {offsets = [0, 96], sizes = [8, 32], strides = [1, 1]} : vector<8x128xf32> to vector<8x32xf32>
    %385 = arith.negf %384 : vector<8x32xf32>
    %386 = math.exp %385 : vector<8x32xf32>
    %cst_98 = arith.constant 1.000000e+00 : f32
    %387 = vector.broadcast %cst_98 : f32 to vector<8x32xf32>
    %388 = arith.addf %387, %386 : vector<8x32xf32>
    %389 = arith.divf %387, %388 : vector<8x32xf32>
    %390 = arith.mulf %381, %329 : vector<8x32xf32>
    %391 = arith.mulf %375, %383 : vector<8x32xf32>
    %392 = arith.addf %390, %391 : vector<8x32xf32>
    %393 = math.tanh %392 : vector<8x32xf32>
    %394 = arith.mulf %389, %393 : vector<8x32xf32>
    %395 = arith.maximumf %332, %369 : vector<8x32xf32>
    %396 = arith.maximumf %333, %394 : vector<8x32xf32>
    %c6_i32 = arith.constant 6 : i32
    %397 = arith.index_cast %c6_i32 : i32 to index
    %c0_99 = arith.constant 0 : index
    %c0_100 = arith.constant 0 : index
    %398 = vector.load %arg14[%397, %c0_99, %c0_100] : memref<8x8x128xf32, #tpu.memory_space<vmem>>, vector<1x8x128xf32>
    %399 = vector.shape_cast %398 : vector<1x8x128xf32> to vector<8x128xf32>
    %cst_101 = arith.constant dense<0.000000e+00> : vector<8x128xf32>
    %400 = tpu.matmul %369, %15, %cst_101 {dimension_numbers = #tpu.dot_dimension_numbers<[1], [0], [0], [1], [0, 0, 1, 1], [], []>} : vector<8x32xf32>, vector<32x128xf32>, vector<8x128xf32> -> vector<8x128xf32>
    %401 = arith.addf %399, %400 : vector<8x128xf32>
    %c7_i32_102 = arith.constant 7 : i32
    %402 = arith.subi %c7_i32_102, %c6_i32 : i32
    %403 = arith.index_cast %402 : i32 to index
    %c0_103 = arith.constant 0 : index
    %c0_104 = arith.constant 0 : index
    %404 = vector.load %arg15[%403, %c0_103, %c0_104] : memref<8x8x128xf32, #tpu.memory_space<vmem>>, vector<1x8x128xf32>
    %405 = vector.shape_cast %404 : vector<1x8x128xf32> to vector<8x128xf32>
    %cst_105 = arith.constant dense<0.000000e+00> : vector<8x128xf32>
    %406 = tpu.matmul %394, %16, %cst_105 {dimension_numbers = #tpu.dot_dimension_numbers<[1], [0], [0], [1], [0, 0, 1, 1], [], []>} : vector<8x32xf32>, vector<32x128xf32>, vector<8x128xf32> -> vector<8x128xf32>
    %407 = arith.addf %405, %406 : vector<8x128xf32>
    %408 = vector.extract_strided_slice %401 {offsets = [0, 0], sizes = [8, 32], strides = [1, 1]} : vector<8x128xf32> to vector<8x32xf32>
    %409 = arith.negf %408 : vector<8x32xf32>
    %410 = math.exp %409 : vector<8x32xf32>
    %cst_106 = arith.constant 1.000000e+00 : f32
    %411 = vector.broadcast %cst_106 : f32 to vector<8x32xf32>
    %412 = arith.addf %411, %410 : vector<8x32xf32>
    %413 = arith.divf %411, %412 : vector<8x32xf32>
    %414 = vector.extract_strided_slice %401 {offsets = [0, 32], sizes = [8, 32], strides = [1, 1]} : vector<8x128xf32> to vector<8x32xf32>
    %415 = arith.negf %414 : vector<8x32xf32>
    %416 = math.exp %415 : vector<8x32xf32>
    %cst_107 = arith.constant 1.000000e+00 : f32
    %417 = vector.broadcast %cst_107 : f32 to vector<8x32xf32>
    %418 = arith.addf %417, %416 : vector<8x32xf32>
    %419 = arith.divf %417, %418 : vector<8x32xf32>
    %420 = vector.extract_strided_slice %401 {offsets = [0, 64], sizes = [8, 32], strides = [1, 1]} : vector<8x128xf32> to vector<8x32xf32>
    %421 = math.tanh %420 : vector<8x32xf32>
    %422 = vector.extract_strided_slice %401 {offsets = [0, 96], sizes = [8, 32], strides = [1, 1]} : vector<8x128xf32> to vector<8x32xf32>
    %423 = arith.negf %422 : vector<8x32xf32>
    %424 = math.exp %423 : vector<8x32xf32>
    %cst_108 = arith.constant 1.000000e+00 : f32
    %425 = vector.broadcast %cst_108 : f32 to vector<8x32xf32>
    %426 = arith.addf %425, %424 : vector<8x32xf32>
    %427 = arith.divf %425, %426 : vector<8x32xf32>
    %428 = arith.mulf %419, %367 : vector<8x32xf32>
    %429 = arith.mulf %413, %421 : vector<8x32xf32>
    %430 = arith.addf %428, %429 : vector<8x32xf32>
    %431 = math.tanh %430 : vector<8x32xf32>
    %432 = arith.mulf %427, %431 : vector<8x32xf32>
    %433 = vector.extract_strided_slice %407 {offsets = [0, 0], sizes = [8, 32], strides = [1, 1]} : vector<8x128xf32> to vector<8x32xf32>
    %434 = arith.negf %433 : vector<8x32xf32>
    %435 = math.exp %434 : vector<8x32xf32>
    %cst_109 = arith.constant 1.000000e+00 : f32
    %436 = vector.broadcast %cst_109 : f32 to vector<8x32xf32>
    %437 = arith.addf %436, %435 : vector<8x32xf32>
    %438 = arith.divf %436, %437 : vector<8x32xf32>
    %439 = vector.extract_strided_slice %407 {offsets = [0, 32], sizes = [8, 32], strides = [1, 1]} : vector<8x128xf32> to vector<8x32xf32>
    %440 = arith.negf %439 : vector<8x32xf32>
    %441 = math.exp %440 : vector<8x32xf32>
    %cst_110 = arith.constant 1.000000e+00 : f32
    %442 = vector.broadcast %cst_110 : f32 to vector<8x32xf32>
    %443 = arith.addf %442, %441 : vector<8x32xf32>
    %444 = arith.divf %442, %443 : vector<8x32xf32>
    %445 = vector.extract_strided_slice %407 {offsets = [0, 64], sizes = [8, 32], strides = [1, 1]} : vector<8x128xf32> to vector<8x32xf32>
    %446 = math.tanh %445 : vector<8x32xf32>
    %447 = vector.extract_strided_slice %407 {offsets = [0, 96], sizes = [8, 32], strides = [1, 1]} : vector<8x128xf32> to vector<8x32xf32>
    %448 = arith.negf %447 : vector<8x32xf32>
    %449 = math.exp %448 : vector<8x32xf32>
    %cst_111 = arith.constant 1.000000e+00 : f32
    %450 = vector.broadcast %cst_111 : f32 to vector<8x32xf32>
    %451 = arith.addf %450, %449 : vector<8x32xf32>
    %452 = arith.divf %450, %451 : vector<8x32xf32>
    %453 = arith.mulf %444, %392 : vector<8x32xf32>
    %454 = arith.mulf %438, %446 : vector<8x32xf32>
    %455 = arith.addf %453, %454 : vector<8x32xf32>
    %456 = math.tanh %455 : vector<8x32xf32>
    %457 = arith.mulf %452, %456 : vector<8x32xf32>
    %458 = arith.maximumf %395, %432 : vector<8x32xf32>
    %459 = arith.maximumf %396, %457 : vector<8x32xf32>
    %c7_i32_112 = arith.constant 7 : i32
    %460 = arith.index_cast %c7_i32_112 : i32 to index
    %c0_113 = arith.constant 0 : index
    %c0_114 = arith.constant 0 : index
    %461 = vector.load %arg14[%460, %c0_113, %c0_114] : memref<8x8x128xf32, #tpu.memory_space<vmem>>, vector<1x8x128xf32>
    %462 = vector.shape_cast %461 : vector<1x8x128xf32> to vector<8x128xf32>
    %cst_115 = arith.constant dense<0.000000e+00> : vector<8x128xf32>
    %463 = tpu.matmul %432, %15, %cst_115 {dimension_numbers = #tpu.dot_dimension_numbers<[1], [0], [0], [1], [0, 0, 1, 1], [], []>} : vector<8x32xf32>, vector<32x128xf32>, vector<8x128xf32> -> vector<8x128xf32>
    %464 = arith.addf %462, %463 : vector<8x128xf32>
    %c7_i32_116 = arith.constant 7 : i32
    %465 = arith.subi %c7_i32_116, %c7_i32_112 : i32
    %466 = arith.index_cast %465 : i32 to index
    %c0_117 = arith.constant 0 : index
    %c0_118 = arith.constant 0 : index
    %467 = vector.load %arg15[%466, %c0_117, %c0_118] : memref<8x8x128xf32, #tpu.memory_space<vmem>>, vector<1x8x128xf32>
    %468 = vector.shape_cast %467 : vector<1x8x128xf32> to vector<8x128xf32>
    %cst_119 = arith.constant dense<0.000000e+00> : vector<8x128xf32>
    %469 = tpu.matmul %457, %16, %cst_119 {dimension_numbers = #tpu.dot_dimension_numbers<[1], [0], [0], [1], [0, 0, 1, 1], [], []>} : vector<8x32xf32>, vector<32x128xf32>, vector<8x128xf32> -> vector<8x128xf32>
    %470 = arith.addf %468, %469 : vector<8x128xf32>
    %471 = vector.extract_strided_slice %464 {offsets = [0, 0], sizes = [8, 32], strides = [1, 1]} : vector<8x128xf32> to vector<8x32xf32>
    %472 = arith.negf %471 : vector<8x32xf32>
    %473 = math.exp %472 : vector<8x32xf32>
    %cst_120 = arith.constant 1.000000e+00 : f32
    %474 = vector.broadcast %cst_120 : f32 to vector<8x32xf32>
    %475 = arith.addf %474, %473 : vector<8x32xf32>
    %476 = arith.divf %474, %475 : vector<8x32xf32>
    %477 = vector.extract_strided_slice %464 {offsets = [0, 32], sizes = [8, 32], strides = [1, 1]} : vector<8x128xf32> to vector<8x32xf32>
    %478 = arith.negf %477 : vector<8x32xf32>
    %479 = math.exp %478 : vector<8x32xf32>
    %cst_121 = arith.constant 1.000000e+00 : f32
    %480 = vector.broadcast %cst_121 : f32 to vector<8x32xf32>
    %481 = arith.addf %480, %479 : vector<8x32xf32>
    %482 = arith.divf %480, %481 : vector<8x32xf32>
    %483 = vector.extract_strided_slice %464 {offsets = [0, 64], sizes = [8, 32], strides = [1, 1]} : vector<8x128xf32> to vector<8x32xf32>
    %484 = math.tanh %483 : vector<8x32xf32>
    %485 = vector.extract_strided_slice %464 {offsets = [0, 96], sizes = [8, 32], strides = [1, 1]} : vector<8x128xf32> to vector<8x32xf32>
    %486 = arith.negf %485 : vector<8x32xf32>
    %487 = math.exp %486 : vector<8x32xf32>
    %cst_122 = arith.constant 1.000000e+00 : f32
    %488 = vector.broadcast %cst_122 : f32 to vector<8x32xf32>
    %489 = arith.addf %488, %487 : vector<8x32xf32>
    %490 = arith.divf %488, %489 : vector<8x32xf32>
    %491 = arith.mulf %482, %430 : vector<8x32xf32>
    %492 = arith.mulf %476, %484 : vector<8x32xf32>
    %493 = arith.addf %491, %492 : vector<8x32xf32>
    %494 = math.tanh %493 : vector<8x32xf32>
    %495 = arith.mulf %490, %494 : vector<8x32xf32>
    %496 = vector.extract_strided_slice %470 {offsets = [0, 0], sizes = [8, 32], strides = [1, 1]} : vector<8x128xf32> to vector<8x32xf32>
    %497 = arith.negf %496 : vector<8x32xf32>
    %498 = math.exp %497 : vector<8x32xf32>
    %cst_123 = arith.constant 1.000000e+00 : f32
    %499 = vector.broadcast %cst_123 : f32 to vector<8x32xf32>
    %500 = arith.addf %499, %498 : vector<8x32xf32>
    %501 = arith.divf %499, %500 : vector<8x32xf32>
    %502 = vector.extract_strided_slice %470 {offsets = [0, 32], sizes = [8, 32], strides = [1, 1]} : vector<8x128xf32> to vector<8x32xf32>
    %503 = arith.negf %502 : vector<8x32xf32>
    %504 = math.exp %503 : vector<8x32xf32>
    %cst_124 = arith.constant 1.000000e+00 : f32
    %505 = vector.broadcast %cst_124 : f32 to vector<8x32xf32>
    %506 = arith.addf %505, %504 : vector<8x32xf32>
    %507 = arith.divf %505, %506 : vector<8x32xf32>
    %508 = vector.extract_strided_slice %470 {offsets = [0, 64], sizes = [8, 32], strides = [1, 1]} : vector<8x128xf32> to vector<8x32xf32>
    %509 = math.tanh %508 : vector<8x32xf32>
    %510 = vector.extract_strided_slice %470 {offsets = [0, 96], sizes = [8, 32], strides = [1, 1]} : vector<8x128xf32> to vector<8x32xf32>
    %511 = arith.negf %510 : vector<8x32xf32>
    %512 = math.exp %511 : vector<8x32xf32>
    %cst_125 = arith.constant 1.000000e+00 : f32
    %513 = vector.broadcast %cst_125 : f32 to vector<8x32xf32>
    %514 = arith.addf %513, %512 : vector<8x32xf32>
    %515 = arith.divf %513, %514 : vector<8x32xf32>
    %516 = arith.mulf %507, %455 : vector<8x32xf32>
    %517 = arith.mulf %501, %509 : vector<8x32xf32>
    %518 = arith.addf %516, %517 : vector<8x32xf32>
    %519 = math.tanh %518 : vector<8x32xf32>
    %520 = arith.mulf %515, %519 : vector<8x32xf32>
    %521 = arith.maximumf %458, %495 : vector<8x32xf32>
    %522 = arith.maximumf %459, %520 : vector<8x32xf32>
    %c8_i32 = arith.constant 8 : i32
    %523 = tpu.concatenate %521, %522 in 1 : vector<8x32xf32>, vector<8x32xf32> -> vector<8x64xf32>
    %524 = math.tanh %523 : vector<8x64xf32>
    %c0_126 = arith.constant 0 : index
    %c0_127 = arith.constant 0 : index
    %525 = vector.load %arg7[%c0_126, %c0_127] : memref<64x64xf32, #tpu.memory_space<vmem>>, vector<64x64xf32>
    %cst_128 = arith.constant dense<0.000000e+00> : vector<8x64xf32>
    %526 = tpu.matmul %524, %525, %cst_128 {dimension_numbers = #tpu.dot_dimension_numbers<[1], [0], [0], [1], [0, 0, 1, 1], [], []>} : vector<8x64xf32>, vector<64x64xf32>, vector<8x64xf32> -> vector<8x64xf32>
    %c0_129 = arith.constant 0 : index
    %c0_130 = arith.constant 0 : index
    %527 = vector.load %arg8[%c0_129, %c0_130] : memref<1x64xf32, #tpu.memory_space<vmem>>, vector<1x64xf32>
    %528 = vector.broadcast %527 : vector<1x64xf32> to vector<8x64xf32>
    %529 = arith.addf %526, %528 : vector<8x64xf32>
    %c0_131 = arith.constant 0 : index
    %c0_132 = arith.constant 0 : index
    %530 = vector.load %arg9[%c0_131, %c0_132] : memref<64x64xf32, #tpu.memory_space<vmem>>, vector<64x64xf32>
    %cst_133 = arith.constant dense<0.000000e+00> : vector<8x64xf32>
    %531 = tpu.matmul %523, %530, %cst_133 {dimension_numbers = #tpu.dot_dimension_numbers<[1], [0], [0], [1], [0, 0, 1, 1], [], []>} : vector<8x64xf32>, vector<64x64xf32>, vector<8x64xf32> -> vector<8x64xf32>
    %c0_134 = arith.constant 0 : index
    %c0_135 = arith.constant 0 : index
    %532 = vector.load %arg10[%c0_134, %c0_135] : memref<1x64xf32, #tpu.memory_space<vmem>>, vector<1x64xf32>
    %533 = vector.broadcast %532 : vector<1x64xf32> to vector<8x64xf32>
    %534 = arith.addf %531, %533 : vector<8x64xf32>
    %535 = arith.negf %534 : vector<8x64xf32>
    %536 = math.exp %535 : vector<8x64xf32>
    %cst_136 = arith.constant 1.000000e+00 : f32
    %537 = vector.broadcast %cst_136 : f32 to vector<8x64xf32>
    %538 = arith.addf %537, %536 : vector<8x64xf32>
    %539 = arith.divf %537, %538 : vector<8x64xf32>
    %540 = arith.mulf %529, %539 : vector<8x64xf32>
    %cst_137 = arith.constant 1.000000e+00 : f32
    %541 = vector.broadcast %cst_137 : f32 to vector<8x64xf32>
    %542 = arith.subf %541, %539 : vector<8x64xf32>
    %543 = arith.mulf %542, %523 : vector<8x64xf32>
    %544 = arith.addf %540, %543 : vector<8x64xf32>
    %c0_138 = arith.constant 0 : index
    %c0_139 = arith.constant 0 : index
    %545 = vector.load %arg11[%c0_138, %c0_139] : memref<64x128xf32, #tpu.memory_space<vmem>>, vector<64x128xf32>
    %cst_140 = arith.constant dense<0.000000e+00> : vector<8x128xf32>
    %546 = tpu.matmul %544, %545, %cst_140 {dimension_numbers = #tpu.dot_dimension_numbers<[1], [0], [0], [1], [0, 0, 1, 1], [], []>} : vector<8x64xf32>, vector<64x128xf32>, vector<8x128xf32> -> vector<8x128xf32>
    %c0_141 = arith.constant 0 : index
    %c0_142 = arith.constant 0 : index
    %547 = vector.load %arg12[%c0_141, %c0_142] : memref<1x128xf32, #tpu.memory_space<vmem>>, vector<1x128xf32>
    %548 = vector.broadcast %547 : vector<1x128xf32> to vector<8x128xf32>
    %549 = arith.addf %546, %548 : vector<8x128xf32>
    %c0_143 = arith.constant 0 : index
    %c0_144 = arith.constant 0 : index
    %550 = vector.load %arg13[%c0_143, %c0_144] : memref<8x128xf32, #tpu.memory_space<vmem>>, vector<8x128xf32>
    tpu.vector_store %arg13[%c0_143, %c0_144], %549 {strides = array<i32>} : memref<8x128xf32, #tpu.memory_space<vmem>>, vector<8x128xf32>,
    return
  }
}

</mosaic_0001>

<bundles_post_ra>
// kernel: tpu_custom_call.1
= control target key start
LH: loop header
LB: loop body
LE: loop exit
PB: predicated region body
PF: predicated region fallthrough
CT: control target
= control target key end

     0   :  { %18 = vsyncpa [#allocation5], 0  ;;  %s3735_s0 = inlined_call_operand.vmem [shape: f32[64,32], index: 0, kind: input, shape index: {}]   ;;  %s3736_s1 = inlined_call_operand.vmem [shape: f32[32,128], index: 1, kind: input, shape index: {}]   ;;  %s3737_s2 = inlined_call_operand.hbm [shape: f32[32,128], index: 2, kind: input, shape index: {}]   ;;  %s3738_s3 = inlined_call_operand.vmem [shape: f32[1,128], index: 3, kind: input, shape index: {}]   ;;  %s3739_s4 = inlined_call_operand.hbm [shape: f32[32,128], index: 4, kind: input, shape index: {}]   ;;  %s3740_s5 = inlined_call_operand.hbm [shape: f32[32,128], index: 5, kind: input, shape index: {}]   ;;  %s3741_s6 = inlined_call_operand.vmem [shape: f32[1,128], index: 6, kind: input, shape index: {}]   ;;  %s3742_s7 = inlined_call_operand.vmem [shape: f32[64,64], index: 7, kind: input, shape index: {}]   ;;  %s3743_s8 = inlined_call_operand.vmem [shape: f32[1,64], index: 8, kind: input, shape index: {}]   ;;  %s3744_s9 = inlined_call_operand.hbm [shape: f32[64,64], index: 9, kind: input, shape index: {}]   ;;  %s3745_s10 = inlined_call_operand.vmem [shape: f32[1,64], index: 10, kind: input, shape index: {}]   ;;  %s3746_s11 = inlined_call_operand.hbm [shape: f32[64,128], index: 11, kind: input, shape index: {}]   ;;  %s3747_s12 = inlined_call_operand.vmem [shape: f32[1,128], index: 12, kind: input, shape index: {}]   ;;  %s3748_s13 = inlined_call_operand.hbm [shape: f32[8,128], index: 13, kind: output, shape index: {}]  }
   0x1   :  { %19 = vsyncpa [#allocation8], 0 }
   0x2   :  { %20 = vsyncpa [#allocation11], 0 }
   0x3   :  { %21 = vsyncpa [#allocation6], 0  ;;  %s3085_s25 = smov [#allocation7]   ;;  %s3086_s27 = smov [#allocation10]  }
   0x4   :  { %s45_s26 = sshll.u32 %s3085_s25, 4  ;;  %s75_s28 = sshll.u32 %s3086_s27, 4  ;;  %s46_s26 = int_to_ptr.vmem [resolvable:$true] %s45_s26  ;;  %s76_s28 = int_to_ptr.vmem [resolvable:$true] %s75_s28 }
   0x5   :  { %s2965_s29 = scalar_lea.vmem %s46_s26, 512  ;;  %p2970_p1 = scmp.lt.s32.totalorder %s46_s26, %s46_s26 }
   0x6   :  { %p2966_p0 = scmp.ne.s32.totalorder %s46_s26, %s2965_s29  ;;  %p2971_p2 = scmp.lt.s32.totalorder %s2965_s29, %s2965_s29 }
   0x8   :  { %p2972_p3 = por %p2971_p2, %p2970_p1 }
   0xa   :  { %p2973_p4 = pnand %p2972_p3, %p2966_p0 }
   0xc   :  { %2976 = shalt.err (!%p2973_p4)
}
   0xd   :  { %s3087_s30 = smov 128   ;;  %s3088_s14 = smov 8  }
   0xe   :  { %51 = dma.hbm_to_vmem [thread:$0]  %s3739_s4, 512, %s46_s26, [#allocation8], %s3087_s30, %s3087_s30, %s3088_s14  }
   0xf   :  { %s2985_s17 = scalar_lea.vmem %s76_s28, 1024  ;;  %p2990_p6 = scmp.lt.s32.totalorder %s76_s28, %s76_s28 }
  0x10   :  { %p2986_p5 = scmp.ne.s32.totalorder %s76_s28, %s2985_s17  ;;  %p2991_p7 = scmp.lt.s32.totalorder %s2985_s17, %s2985_s17 }
  0x12   :  { %p2992_p8 = por %p2991_p7, %p2990_p6 }
  0x14   :  { %p2993_p9 = pnand %p2992_p8, %p2986_p5 }
  0x16   :  { %2996 = shalt.err (!%p2993_p9)
}
  0x17   :  { %81 = dma.hbm_to_vmem [thread:$0]  %s3744_s9, 1024, %s76_s28, [#allocation11], %s3087_s30, %s3087_s30, %s3088_s14  }
  0x18   :  { %s3089_s20 = smov [#allocation4]   ;;  %s3090_s22 = smov [#allocation9]  }
  0x19   :  { %s31_s21 = sshll.u32 %s3089_s20, 4  ;;  %s57_s23 = sshll.u32 %s3090_s22, 4  ;;  %s32_s21 = int_to_ptr.vmem [resolvable:$true] %s31_s21  ;;  %s58_s23 = int_to_ptr.vmem [resolvable:$true] %s57_s23 }
  0x1a   :  { %s3005_s4 = scalar_lea.vmem %s32_s21, 512  ;;  %p3010_p11 = scmp.lt.s32.totalorder %s32_s21, %s32_s21 }
  0x1b   :  { %p3006_p10 = scmp.ne.s32.totalorder %s32_s21, %s3005_s4  ;;  %p3011_p12 = scmp.lt.s32.totalorder %s3005_s4, %s3005_s4 }
  0x1d   :  { %p3012_p13 = por %p3011_p12, %p3010_p11 }
  0x1f   :  { %p3013_p0 = pnand %p3012_p13, %p3006_p10 }
  0x21   :  { %3016 = shalt.err (!%p3013_p0)
}
  0x22   :  { %37 = dma.hbm_to_vmem [thread:$0]  %s3737_s2, 512, %s32_s21, [#allocation5], %s3087_s30, %s3087_s30, %s3088_s14  }
  0x23   :  { %s3025_s9 = scalar_lea.vmem %s58_s23, 512  ;;  %p3030_p2 = scmp.lt.s32.totalorder %s58_s23, %s58_s23 }
  0x24   :  { %p3026_p1 = scmp.ne.s32.totalorder %s58_s23, %s3025_s9  ;;  %p3031_p3 = scmp.lt.s32.totalorder %s3025_s9, %s3025_s9 }
  0x26   :  { %p3032_p4 = por %p3031_p3, %p3030_p2 }
  0x28   :  { %p3033_p5 = pnand %p3032_p4, %p3026_p1 }
  0x2a   :  { %3036 = shalt.err (!%p3033_p5)
}
  0x2b   :  { %63 = dma.hbm_to_vmem [thread:$0]  %s3740_s5, 512, %s58_s23, [#allocation8], %s3087_s30, %s3087_s30, %s3088_s14  }
  0x2c   :  { %s3091_s28 = smov [#allocation12]  }
  0x2d   :  { %s89_s29 = sshll.u32 %s3091_s28, 4  ;;  %s90_s29 = int_to_ptr.vmem [resolvable:$true] %s89_s29 }
  0x2e   :  { %s3045_s15 = scalar_lea.vmem %s90_s29, 1024  ;;  %p3050_p7 = scmp.lt.s32.totalorder %s90_s29, %s90_s29 }
  0x2f   :  { %p3046_p6 = scmp.ne.s32.totalorder %s90_s29, %s3045_s15  ;;  %p3051_p8 = scmp.lt.s32.totalorder %s3045_s15, %s3045_s15 }
  0x31   :  { %p3052_p9 = por %p3051_p8, %p3050_p7 }
  0x33   :  { %p3053_p10 = pnand %p3052_p9, %p3046_p6 }
  0x35   :  { %3056 = shalt.err (!%p3053_p10)
}
  0x36   :  { %95 = dma.hbm_to_vmem [thread:$0]  %s3746_s11, 1024, %s90_s29, [#allocation11], %s3087_s30, %s3087_s30, %s3088_s14  }
  0x37   :  { %3077 = dma.done.wait [#allocation5], 512  }
  0x38   :  { %3078 = vsyncadd [#allocation5], 4294966784 }
  0x39   :  { %3079 = dma.done.wait [#allocation8], 1024  }
  0x3a   :  { %3080 = vsyncadd [#allocation8], 4294966272 }
  0x3b   :  { %3081 = dma.done.wait [#allocation11], 2048  }
  0x3c   :  { %3082 = vsyncadd [#allocation11], 4294965248  ;;  %v124_v0 = vld [vmem:[%s3736_s1 + $0x18] sm:$0xff]  ;;  %v123_v1 = vld [vmem:[%s3736_s1 + $0x10] sm:$0xff]  ;;  %vm132_vm0 = vcmask 261120   ;;  %v3092_v11 = vmov 0.0  }
  0x3d   :  { %2528 = vmatprep.subr.mxu0 %v124_v0  ;;  %2801 = vmatprep.subr.mxu1 %v124_v0  ;;  %v122_v2 = vld [vmem:[%s3736_s1 + $0x8] sm:$0xff]  ;;  %v121_v3 = vld [vmem:[%s3736_s1] sm:$0xff]  ;;  %v273_v8 = vld [vmem:[#allocation7 + $0x18] sm:$0xff]  ;;  %vm3093_vm1 = vmmov 0   ;;  %s3095_s19 = smov 32   ;;  %vm2064_vm2 = vcmask 523264  }
  0x3e   :  { %2529 = vmatpush3.msra.mxu0 %v124_v0  ;;  %2805 = vmatpush3.msra.mxu1 %v124_v0  ;;  %v113_v4 = vld [vmem:[%s3735_s0] sm:$0xff]  ;;  %v114_v6 = vld [vmem:[%s3735_s0 + $0x8] sm:$0xff]  ;;  %v3225_v9 = vld [vmem:[#allocation4 + $0x18] sm:$0xff] }
  0x3f   :  { %2530 = vmatprep.subr.mxu0 %v123_v1  ;;  %2802 = vmatprep.subr.mxu1 %v123_v1  ;;  %v117_v5 = vld [vmem:[%s3735_s0 + $0x20] sm:$0xff]  ;;  %v3221_v7 = vld [vmem:[%s3735_s0 + $0x28] sm:$0xff]  ;;  %v272_v10 = vld [vmem:[#allocation7 + $0x10] sm:$0xff] }
  0x40   :  { %2531 = vmatpush3.msra.mxu0 %v123_v1  ;;  %2806 = vmatpush3.msra.mxu1 %v123_v1  ;;  %v115_v12 = vld [vmem:[%s3735_s0 + $0x10] sm:$0xff]  ;;  %v116_v15 = vld [vmem:[%s3735_s0 + $0x18] sm:$0xff]  ;;  %v271_v17 = vld [vmem:[#allocation7 + $0x8] sm:$0xff] }
  0x41   :  { %2532 = vmatprep.subr.mxu0 %v122_v2  ;;  %2803 = vmatprep.subr.mxu1 %v122_v2  ;;  %v119_v13 = vld [vmem:[%s3735_s0 + $0x30] sm:$0xff]  ;;  %v120_v16 = vld [vmem:[%s3735_s0 + $0x38] sm:$0xff]  ;;  %v3250_v18 = vld [vmem:[#allocation4 + $0x8] sm:$0xff]  ;;  %s3096_s0 = smov [#allocation13]  }
  0x42   :  { %2533 = vmatpush3.msra.mxu0 %v122_v2  ;;  %2807 = vmatpush3.msra.mxu1 %v122_v2  ;;  %v3238_v14 = vld [vmem:[#allocation4 + $0x10] sm:$0xff]  ;;  %v270_v19 = vld [vmem:[#allocation7] sm:$0xff]  ;;  %v3263_v21 = vld [vmem:[#allocation9 + $0x18] sm:$0xff]  ;;  %s2331_s17 = sshll.u32 %s3096_s0, 4  ;;  %s2332_s17 = int_to_ptr.vmem [resolvable:$true] %s2331_s17 }
  0x43   :  { %2534 = vmatprep.subr.mxu0 %v121_v3  ;;  %2804 = vmatprep.subr.mxu1 %v121_v3  ;;  %v3256_v20 = vld [vmem:[#allocation4] sm:$0xff]  ;;  %v3270_v22 = vld [vmem:[#allocation9 + $0x10] sm:$0xff]  ;;  %v3276_v23 = vld [vmem:[#allocation9 + $0x8] sm:$0xff]  ;;  %p3062_p12 = scmp.lt.s32.totalorder %s2332_s17, %s2332_s17 }
  0x44   :  { %2535 = vmatpush3.msra.mxu0 %v121_v3  ;;  %2808 = vmatpush3.msra.mxu1 %v121_v3  ;;  %v3282_v24 = vld [vmem:[#allocation9] sm:$0xff] }
  0x45   :  { %2536 = vmatprep.mubr.msk.f32.mxu0 %vm132_vm0, %v113_v4  ;;  %2542 = vmatprep.mubr.msk.f32.mxu1 %vm132_vm0, %v117_v5  ;;  %v2342_v25 = vld [vmem:[%s3738_s3] ss:$0 sm:$0xff] }
  0x46   :  { %2537 = vmatmul.mubr.msk.f32.vlgmr.msra.gmra.mxu0 %vm132_vm0, %v114_v6  ;;  %2543 = vmatmul.mubr.msk.f32.vlgmr.msra.gmra.mxu1 %vm132_vm0, %v3221_v7  ;;  %v2351_v42 = vld [vmem:[%s3741_s6] ss:$0 sm:$0xff]  ;;  %s3094_s6 = smov 64  }
  0x47   :  { %2548 = vmatprep.subr.mxu1 %v273_v8  ;;  %2568 = vmatprep.subr.mxu0 %v3092_v11 }
  0x48   :  { %2549 = vmatpush3.msra.mxu1 %v273_v8  ;;  %2569 = vmatpush3.msra.mxu0 %v3225_v9 }
  0x49   :  { %2550 = vmatprep.subr.mxu1 %v272_v10  ;;  %2570 = vmatprep.subr.mxu0 %v3092_v11 }
  0x4a   :  { %2539 = vmatprep.mubr.msk.f32.mxu0 %vm132_vm0, %v115_v12  ;;  %2545 = vmatprep.mubr.msk.f32.mxu1 %vm132_vm0, %v119_v13 }
  0x4b   :  { %2551 = vmatpush3.msra.mxu1 %v272_v10  ;;  %2571 = vmatpush3.msra.mxu0 %v3238_v14 }
  0x4c   :  { %2540 = vmatmul.mubr.msk.f32.gmra.mxu0 %vm132_vm0, %v116_v15  ;;  %2546 = vmatmul.mubr.msk.f32.gmra.mxu1 %vm132_vm0, %v120_v16 }
  0x4d   :  { %2552 = vmatprep.subr.mxu1 %v271_v17  ;;  %2572 = vmatprep.subr.mxu0 %v3092_v11 }
  0x4e   :  { %2553 = vmatpush3.msra.mxu1 %v271_v17  ;;  %2573 = vmatpush3.msra.mxu0 %v3250_v18 }
  0x4f   :  { %2554 = vmatprep.subr.mxu1 %v270_v19  ;;  %2574 = vmatprep.subr.mxu0 %v3092_v11 }
  0x50   :  { %2555 = vmatpush3.msra.mxu1 %v270_v19  ;;  %2556 = vmatprep.mubr.msk.f32.mxu1 %vm132_vm0, %v113_v4 }
  0x51   :  { %2575 = vmatpush3.msra.mxu0 %v3256_v20  ;;  %2576 = vmatprep.mubr.msk.f32.mxu0 %vm3093_vm1, %v3092_v11 }
  0x52   :  { %2557 = vmatmul.mubr.msk.f32.vlgmr.msra.gmra.mxu1 %vm132_vm0, %v114_v6  ;;  %2577 = vmatmul.mubr.f32.vlgmr.msra.gmra.mxu0 %v3092_v11 }
  0x53   :  { %2579 = vmatprep.subr.mxu1 %v3092_v11  ;;  %2559 = vmatprep.mubr.msk.f32.mxu1 %vm132_vm0, %v115_v12 }
  0x54   :  { %2580 = vmatpush3.msra.mxu1 %v3263_v21  ;;  %2590 = vmatprep.subr.mxu0 %v3092_v11 }
  0x55   :  { %2581 = vmatprep.subr.mxu1 %v3092_v11  ;;  %2591 = vmatpush3.msra.mxu0 %v3225_v9 }
  0x56   :  { %2560 = vmatmul.mubr.msk.f32.gmra.mxu1 %vm132_vm0, %v116_v15  ;;  %2592 = vmatprep.subr.mxu0 %v3092_v11 }
  0x57   :  { %2582 = vmatpush3.msra.mxu1 %v3270_v22  ;;  %2562 = vmatprep.mubr.msk.f32.mxu1 %vm132_vm0, %v117_v5 }
  0x58   :  { %2583 = vmatprep.subr.mxu1 %v3092_v11  ;;  %2593 = vmatpush3.msra.mxu0 %v3238_v14 }
  0x59   :  { %2584 = vmatpush3.msra.mxu1 %v3276_v23  ;;  %2594 = vmatprep.subr.mxu0 %v3092_v11 }
  0x5a   :  { %2563 = vmatmul.mubr.msk.f32.gmra.mxu1 %vm132_vm0, %v3221_v7  ;;  %2585 = vmatprep.subr.mxu1 %v3092_v11 }
  0x5b   :  { %2565 = vmatprep.mubr.msk.f32.mxu1 %vm132_vm0, %v119_v13  ;;  %2586 = vmatpush3.msra.mxu1 %v3282_v24 }
  0x5c   :  { %2595 = vmatpush3.msra.mxu0 %v3250_v18  ;;  %2598 = vmatprep.mubr.msk.f32.mxu0 %vm3093_vm1, %v3092_v11 }
  0x5d   :  { %2596 = vmatprep.subr.mxu0 %v3092_v11  ;;  %2601 = vmatprep.subr.mxu1 %v3092_v11 }
  0x5e   :  { %2566 = vmatmul.mubr.msk.f32.gmra.mxu1 %vm132_vm0, %v120_v16  ;;  %2597 = vmatpush3.msra.mxu0 %v3256_v20 }
  0x5f   :  { %2587 = vmatprep.mubr.msk.f32.mxu1 %vm3093_vm1, %v3092_v11  ;;  %2612 = vmatprep.subr.mxu0 %v3092_v11 }
  0x62   :  { %2588 = vmatmul.mubr.f32.vlgmr.msra.gmra.mxu1 %v3092_v11 }
  0x63   :  { %2602 = vmatpush3.msra.mxu1 %v3263_v21  ;;  %2609 = vmatprep.mubr.msk.f32.mxu1 %vm3093_vm1, %v3092_v11 }
  0x64   :  { %2603 = vmatprep.subr.mxu1 %v3092_v11 }
  0x65   :  { %2604 = vmatpush3.msra.mxu1 %v3270_v22 }
  0x66   :  { %2605 = vmatprep.subr.mxu1 %v3092_v11 }
  0x67   :  { %2606 = vmatpush3.msra.mxu1 %v3276_v23 }
  0x68   :  { %2607 = vmatprep.subr.mxu1 %v3092_v11 }
  0x69   :  { %2608 = vmatpush3.msra.mxu1 %v3282_v24 }
  0x6a   :  { %2623 = vmatprep.subr.mxu1 %v3092_v11 }
 0x106   :  { %v2538_v26 = vpop.f32.mrf.mxu0  ;;  %v2544_v27 = vpop.f32.mrf.mxu1 }
 0x107   :  { %v3316_v28 = vadd.f32 %v2538_v26, %v2342_v25  ;;  %v3318_v29 = vadd.f32 %v2544_v27, %v2342_v25 }
 0x108   :  { %v223_v30 = vpop.f32.mrf.mxu0  ;;  %v243_v31 = vpop.f32.mrf.mxu1 }
 0x109   :  { %v3320_v32 = vadd.f32 %v2342_v25, %v243_v31  ;;  %v224_v39 = vadd.f32 %v2342_v25, %v223_v30 }
 0x10c   :  { %v2541_v33 = vpop.f32.mrf.mxu0  ;;  %v2547_v34 = vpop.f32.mrf.mxu1 }
 0x10d   :  { %v3322_v35 = vadd.f32 %v2541_v33, %v2342_v25  ;;  %v3324_v36 = vadd.f32 %v2547_v34, %v2342_v25 }
 0x10e   :  { %v233_v37 = vpop.f32.mrf.mxu0  ;;  %v253_v38 = vpop.f32.mrf.mxu1 }
 0x10f   :  { %v3326_v40 = vadd.f32 %v2342_v25, %v233_v37  ;;  %v3328_v41 = vadd.f32 %v2342_v25, %v253_v38 }
 0x112   :  { %v2558_v43 = vpop.f32.mrf.mxu1  ;;  %v472_v44 = vpop.f32.mrf.mxu0 }
 0x113   :  { %v3333_v45 = vadd.f32 %v2558_v43, %v2351_v42  ;;  %v476_v46 = vadd.f32 %v472_v44, %v224_v39 }
 0x114   :  { %v347_v47 = vpop.f32.mrf.mxu1  ;;  %v2578_v48 = vpop.f32.mrf.mxu0 }
 0x115   :  { %2821 = vtanh.f32 %v476_v46  ;;  %v3335_v49 = vadd.f32 %v2351_v42, %v347_v47  ;;  %v2360_v3 = vmul.f32 -1.442695, %v476_v46 }
 0x116   :  { %v2561_v50 = vpop.f32.mrf.mxu1 }
 0x117   :  { %v3337_v51 = vadd.f32 %v2561_v50, %v2351_v42 }
 0x118   :  { %v357_v52 = vpop.f32.mrf.mxu1 }
 0x119   :  { %v3339_v53 = vadd.f32 %v2351_v42, %v357_v52 }
 0x11a   :  { %v2564_v54 = vpop.f32.mrf.mxu1 }
 0x11b   :  { %v3341_v55 = vadd.f32 %v2564_v54, %v2351_v42 }
 0x11c   :  { %v367_v56 = vpop.f32.mrf.mxu1 }
 0x11d   :  { %v3343_v57 = vadd.f32 %v2351_v42, %v367_v56 }
 0x11e   :  { %v2567_v58 = vpop.f32.mrf.mxu1 }
 0x11f   :  { %v383_v60 = vadd.f32 %v2567_v58, %v2351_v42 }
 0x120   :  { %v377_v59 = vpop.f32.mrf.mxu1 }
 0x121   :  { %v3345_v61 = vadd.f32 %v2351_v42, %v377_v59 }
 0x122   :  { %v2822_v62 = vpop.eup %2821  ;;  %v545_v63 = vpop.f32.mrf.mxu1 }
 0x123   :  { %v549_v0 = vadd.f32 %v545_v63, %v383_v60  ;;  %559 = vrot.lane.b32.xlu0 %v2822_v62, %s3094_s6 }
 0x124   :  { %v2589_v1 = vpop.f32.mrf.mxu1 }
 0x125   :  { %2823 = vtanh.f32 %v549_v0  ;;  %v2361_v4 = vmul.f32 -1.442695, %v549_v0 }
 0x126   :  { %2825 = vpow2.f32 %v2360_v3 }
 0x127   :  { %2827 = vpow2.f32 %v2361_v4 }
 0x132   :  { %v2824_v2 = vpop.eup %2823 }
 0x133   :  { %583 = vrot.lane.b32.xlu0 %v2824_v2, %s3094_s6  ;;  %v2826_v5 = vpop.eup %2825 }
 0x134   :  { %v553_v6 = vadd.f32 1.0, %v2826_v5  ;;  %v2828_v7 = vpop.eup %2827 }
 0x135   :  { %v577_v8 = vadd.f32 1.0, %v2828_v7 }
 0x136   :  { %2829 = vrcp.f32 %v553_v6 }
 0x137   :  { %2831 = vrcp.f32 %v577_v8 }
 0x143   :  { %v2830_v10 = vpop.eup %2829 }
 0x144   :  { %v2832_v15 = vpop.eup %2831  ;;  %v557_v19 = vmul.f32 0.0, %v2830_v10 }
 0x145   :  { %v581_v27 = vmul.f32 0.0, %v2832_v15 }
 0x195   :  { %v560_v12 = vpop.permute.xlu0 %559 }
 0x196   :  { %v562_v13 = vmul.f32 %v2830_v10, %v560_v12 }
 0x198   :  { %564 = vrot.lane.b32.xlu1 %v562_v13, %s3095_s19 }
 0x1a5   :  { %v584_v16 = vpop.permute.xlu0 %583 }
 0x1a6   :  { %v586_v17 = vmul.f32 %v2832_v15, %v584_v16 }
 0x1a8   :  { %588 = vrot.lane.b32.xlu1 %v586_v17, %s3095_s19 }
 0x20a   :  { %v565_v25 = vpop.permute.xlu1 %564 }
 0x20b   :  { %v3351_v26 = vadd.f32 %v565_v25, %v557_v19 }
 0x20d   :  { %2833 = vtanh.f32 %v3351_v26 }
 0x21a   :  { %v2834_v30 = vpop.eup %2833  ;;  %v589_v31 = vpop.permute.xlu1 %588 }
 0x21b   :  { %v3354_v33 = vadd.f32 %v589_v31, %v581_v27  ;;  %570 = vrot.lane.b32.xlu0 %v2834_v30, %s3094_s6 }
 0x21d   :  { %2835 = vtanh.f32 %v3354_v33 }
 0x22a   :  { %v2836_v34 = vpop.eup %2835 }
 0x22b   :  { %594 = vrot.lane.b32.xlu1 %v2836_v34, %s3094_s6 }
 0x28d   :  { %v571_v37 = vpop.permute.xlu0 %570 }
 0x28e   :  { %v3359_v38 = vmul.f32 %v2830_v10, %v571_v37 }
 0x290   :  { %601 = vrot.lane.b32.xlu0 %v3359_v38, %s3095_s19 }
 0x29d   :  { %v595_v39 = vpop.permute.xlu1 %594 }
 0x29e   :  { %v3363_v42 = vmul.f32 %v2832_v15, %v595_v39 }
 0x2a0   :  { %679 = vrot.lane.b32.xlu1 %v3363_v42, %s3095_s19 }
 0x302   :  { %v602_v43 = vpop.permute.xlu0 %601 }
 0x303   :  { %2599 = vmatmul.mubr.msk.f32.vlgmr.msra.gmra.mxu0 %vm132_vm0, %v602_v43 }
 0x304   :  { %2613 = vmatpush3.msra.mxu0 %v3225_v9  ;;  %2620 = vmatprep.mubr.msk.f32.mxu0 %vm3093_vm1, %v3092_v11 }
 0x305   :  { %2614 = vmatprep.subr.mxu0 %v3092_v11 }
 0x306   :  { %2615 = vmatpush3.msra.mxu0 %v3238_v14 }
 0x307   :  { %2616 = vmatprep.subr.mxu0 %v3092_v11 }
 0x308   :  { %2617 = vmatpush3.msra.mxu0 %v3250_v18 }
 0x309   :  { %2618 = vmatprep.subr.mxu0 %v3092_v11 }
 0x30a   :  { %2619 = vmatpush3.msra.mxu0 %v3256_v20 }
 0x30b   :  { %2634 = vmatprep.subr.mxu0 %v3092_v11 }
 0x312   :  { %v680_v44 = vpop.permute.xlu1 %679 }
 0x313   :  { %2610 = vmatmul.mubr.msk.f32.vlgmr.msra.gmra.mxu1 %vm132_vm0, %v680_v44 }
 0x314   :  { %2624 = vmatpush3.msra.mxu1 %v3263_v21  ;;  %2631 = vmatprep.mubr.msk.f32.mxu1 %vm3093_vm1, %v3092_v11 }
 0x315   :  { %2625 = vmatprep.subr.mxu1 %v3092_v11 }
 0x316   :  { %2626 = vmatpush3.msra.mxu1 %v3270_v22 }
 0x317   :  { %2627 = vmatprep.subr.mxu1 %v3092_v11 }
 0x318   :  { %2628 = vmatpush3.msra.mxu1 %v3276_v23 }
 0x319   :  { %2629 = vmatprep.subr.mxu1 %v3092_v11 }
 0x31a   :  { %2630 = vmatpush3.msra.mxu1 %v3282_v24 }
 0x31b   :  { %2645 = vmatprep.subr.mxu1 %v3092_v11 }
 0x3c3   :  { %v671_v46 = vpop.f32.mrf.mxu0 }
 0x3c4   :  { %v675_v47 = vadd.f32 %v671_v46, %v3316_v28 }
 0x3c5   :  { %v2600_v48 = vpop.f32.mrf.mxu0 }
 0x3c6   :  { %2837 = vtanh.f32 %v675_v47  ;;  %v2364_v59 = vmul.f32 -1.442695, %v675_v47 }
 0x3d3   :  { %v2838_v50 = vpop.eup %2837  ;;  %v749_v52 = vpop.f32.mrf.mxu1 }
 0x3d4   :  { %v753_v54 = vadd.f32 %v749_v52, %v3345_v61  ;;  %763 = vrot.lane.b32.xlu0 %v2838_v50, %s3094_s6 }
 0x3d5   :  { %v2611_v56 = vpop.f32.mrf.mxu1 }
 0x3d6   :  { %2839 = vtanh.f32 %v753_v54  ;;  %v2365_v60 = vmul.f32 -1.442695, %v753_v54 }
 0x3d7   :  { %2841 = vpow2.f32 %v2364_v59 }
 0x3d8   :  { %2843 = vpow2.f32 %v2365_v60 }
 0x3e3   :  { %v2840_v58 = vpop.eup %2839 }
 0x3e4   :  { %787 = vrot.lane.b32.xlu1 %v2840_v58, %s3094_s6  ;;  %v2842_v62 = vpop.eup %2841 }
 0x3e5   :  { %v757_v63 = vadd.f32 1.0, %v2842_v62  ;;  %v2844_v28 = vpop.eup %2843 }
 0x3e6   :  { %v781_v0 = vadd.f32 1.0, %v2844_v28 }
 0x3e7   :  { %2845 = vrcp.f32 %v757_v63 }
 0x3e8   :  { %2847 = vrcp.f32 %v781_v0 }
 0x3f4   :  { %v2846_v1 = vpop.eup %2845 }
 0x3f5   :  { %v2848_v61 = vpop.eup %2847  ;;  %v761_v6 = vmul.f32 %v2846_v1, %v3351_v26 }
 0x3f6   :  { %v785_v10 = vmul.f32 %v2848_v61, %v3354_v33 }
 0x446   :  { %v764_v2 = vpop.permute.xlu0 %763 }
 0x447   :  { %v766_v3 = vmul.f32 %v2846_v1, %v764_v2 }
 0x449   :  { %768 = vrot.lane.b32.xlu0 %v766_v3, %s3095_s19 }
 0x456   :  { %v788_v4 = vpop.permute.xlu1 %787 }
 0x457   :  { %v790_v5 = vmul.f32 %v2848_v61, %v788_v4 }
 0x459   :  { %792 = vrot.lane.b32.xlu1 %v790_v5, %s3095_s19 }
 0x4bb   :  { %v769_v7 = vpop.permute.xlu0 %768 }
 0x4bc   :  { %v3396_v8 = vadd.f32 %v769_v7, %v761_v6 }
 0x4be   :  { %2849 = vtanh.f32 %v3396_v8 }
 0x4cb   :  { %v2850_v12 = vpop.eup %2849  ;;  %v793_v13 = vpop.permute.xlu1 %792 }
 0x4cc   :  { %v3400_v15 = vadd.f32 %v793_v13, %v785_v10  ;;  %774 = vrot.lane.b32.xlu0 %v2850_v12, %s3094_s6 }
 0x4ce   :  { %2851 = vtanh.f32 %v3400_v15 }
 0x4db   :  { %v2852_v16 = vpop.eup %2851 }
 0x4dc   :  { %798 = vrot.lane.b32.xlu1 %v2852_v16, %s3094_s6 }
 0x53e   :  { %v775_v17 = vpop.permute.xlu0 %774 }
 0x53f   :  { %v3405_v19 = vmul.f32 %v2846_v1, %v775_v17 }
 0x541   :  { %807 = vrot.lane.b32.xlu0 %v3405_v19, %s3095_s19  ;;  %v802_v6 = vmax.f32 %v3359_v38, %v3405_v19 }
 0x54e   :  { %v799_v25 = vpop.permute.xlu1 %798 }
 0x54f   :  { %v3409_v26 = vmul.f32 %v2848_v61, %v799_v25 }
 0x551   :  { %885 = vrot.lane.b32.xlu1 %v3409_v26, %s3095_s19  ;;  %v803_v12 = vmax.f32 %v3363_v42, %v3409_v26 }
 0x5b3   :  { %v808_v27 = vpop.permute.xlu0 %807 }
 0x5b4   :  { %2621 = vmatmul.mubr.msk.f32.vlgmr.msra.gmra.mxu0 %vm132_vm0, %v808_v27 }
 0x5b5   :  { %2635 = vmatpush3.msra.mxu0 %v3225_v9  ;;  %2642 = vmatprep.mubr.msk.f32.mxu0 %vm3093_vm1, %v3092_v11 }
 0x5b6   :  { %2636 = vmatprep.subr.mxu0 %v3092_v11 }
 0x5b7   :  { %2637 = vmatpush3.msra.mxu0 %v3238_v14 }
 0x5b8   :  { %2638 = vmatprep.subr.mxu0 %v3092_v11 }
 0x5b9   :  { %2639 = vmatpush3.msra.mxu0 %v3250_v18 }
 0x5ba   :  { %2640 = vmatprep.subr.mxu0 %v3092_v11 }
 0x5bb   :  { %2641 = vmatpush3.msra.mxu0 %v3256_v20 }
 0x5bc   :  { %2656 = vmatprep.subr.mxu0 %v3092_v11 }
 0x5c3   :  { %v886_v30 = vpop.permute.xlu1 %885 }
 0x5c4   :  { %2632 = vmatmul.mubr.msk.f32.vlgmr.msra.gmra.mxu1 %vm132_vm0, %v886_v30 }
 0x5c5   :  { %2646 = vmatpush3.msra.mxu1 %v3263_v21  ;;  %2653 = vmatprep.mubr.msk.f32.mxu1 %vm3093_vm1, %v3092_v11 }
 0x5c6   :  { %2647 = vmatprep.subr.mxu1 %v3092_v11 }
 0x5c7   :  { %2648 = vmatpush3.msra.mxu1 %v3270_v22 }
 0x5c8   :  { %2649 = vmatprep.subr.mxu1 %v3092_v11 }
 0x5c9   :  { %2650 = vmatpush3.msra.mxu1 %v3276_v23 }
 0x5ca   :  { %2651 = vmatprep.subr.mxu1 %v3092_v11 }
 0x5cb   :  { %2652 = vmatpush3.msra.mxu1 %v3282_v24 }
 0x5cc   :  { %2667 = vmatprep.subr.mxu1 %v3092_v11 }
 0x674   :  { %v877_v31 = vpop.f32.mrf.mxu0 }
 0x675   :  { %v881_v33 = vadd.f32 %v877_v31, %v3326_v40 }
 0x676   :  { %v2622_v34 = vpop.f32.mrf.mxu0 }
 0x677   :  { %2853 = vtanh.f32 %v881_v33  ;;  %v2368_v47 = vmul.f32 -1.442695, %v881_v33 }
 0x684   :  { %v2854_v37 = vpop.eup %2853  ;;  %v955_v39 = vpop.f32.mrf.mxu1 }
 0x685   :  { %v959_v43 = vadd.f32 %v955_v39, %v3341_v55  ;;  %969 = vrot.lane.b32.xlu0 %v2854_v37, %s3094_s6 }
 0x686   :  { %v2633_v44 = vpop.f32.mrf.mxu1 }
 0x687   :  { %2855 = vtanh.f32 %v959_v43  ;;  %v2369_v48 = vmul.f32 -1.442695, %v959_v43 }
 0x688   :  { %2857 = vpow2.f32 %v2368_v47 }
 0x689   :  { %2859 = vpow2.f32 %v2369_v48 }
 0x694   :  { %v2856_v46 = vpop.eup %2855 }
 0x695   :  { %993 = vrot.lane.b32.xlu1 %v2856_v46, %s3094_s6  ;;  %v2858_v50 = vpop.eup %2857 }
 0x696   :  { %v963_v52 = vadd.f32 1.0, %v2858_v50  ;;  %v2860_v40 = vpop.eup %2859 }
 0x697   :  { %v987_v54 = vadd.f32 1.0, %v2860_v40 }
 0x698   :  { %2861 = vrcp.f32 %v963_v52 }
 0x699   :  { %2863 = vrcp.f32 %v987_v54 }
 0x6a5   :  { %v2862_v56 = vpop.eup %2861 }
 0x6a6   :  { %v2864_v55 = vpop.eup %2863  ;;  %v967_v63 = vmul.f32 %v2862_v56, %v3396_v8 }
 0x6a7   :  { %v991_v1 = vmul.f32 %v2864_v55, %v3400_v15 }
 0x6f7   :  { %v970_v58 = vpop.permute.xlu0 %969 }
 0x6f8   :  { %v972_v59 = vmul.f32 %v2862_v56, %v970_v58 }
 0x6fa   :  { %974 = vrot.lane.b32.xlu0 %v972_v59, %s3095_s19 }
 0x707   :  { %v994_v60 = vpop.permute.xlu1 %993 }
 0x708   :  { %v996_v62 = vmul.f32 %v2864_v55, %v994_v60 }
 0x70a   :  { %998 = vrot.lane.b32.xlu1 %v996_v62, %s3095_s19 }
 0x76c   :  { %v975_v28 = vpop.permute.xlu0 %974 }
 0x76d   :  { %v3442_v0 = vadd.f32 %v975_v28, %v967_v63 }
 0x76f   :  { %2865 = vtanh.f32 %v3442_v0 }
 0x77c   :  { %v2866_v2 = vpop.eup %2865  ;;  %v999_v3 = vpop.permute.xlu1 %998 }
 0x77d   :  { %v3446_v61 = vadd.f32 %v999_v3, %v991_v1  ;;  %980 = vrot.lane.b32.xlu0 %v2866_v2, %s3094_s6 }
 0x77f   :  { %2867 = vtanh.f32 %v3446_v61 }
 0x78c   :  { %v2868_v4 = vpop.eup %2867 }
 0x78d   :  { %1004 = vrot.lane.b32.xlu1 %v2868_v4, %s3094_s6 }
 0x7ef   :  { %v981_v5 = vpop.permute.xlu0 %980 }
 0x7f0   :  { %v983_v7 = vmul.f32 %v2862_v56, %v981_v5 }
 0x7f2   :  { %v3453_v8 = vmax.f32 %v802_v6, %v983_v7  ;;  %1013 = vrot.lane.b32.xlu0 %v983_v7, %s3095_s19 }
 0x7ff   :  { %v1005_v10 = vpop.permute.xlu1 %1004 }
 0x800   :  { %v1007_v13 = vmul.f32 %v2864_v55, %v1005_v10 }
 0x802   :  { %v3458_v15 = vmax.f32 %v803_v12, %v1007_v13  ;;  %1091 = vrot.lane.b32.xlu1 %v1007_v13, %s3095_s19 }
 0x864   :  { %v1014_v16 = vpop.permute.xlu0 %1013 }
 0x865   :  { %2643 = vmatmul.mubr.msk.f32.vlgmr.msra.gmra.mxu0 %vm132_vm0, %v1014_v16 }
 0x866   :  { %2657 = vmatpush3.msra.mxu0 %v3225_v9  ;;  %2664 = vmatprep.mubr.msk.f32.mxu0 %vm3093_vm1, %v3092_v11 }
 0x867   :  { %2658 = vmatprep.subr.mxu0 %v3092_v11 }
 0x868   :  { %2659 = vmatpush3.msra.mxu0 %v3238_v14 }
 0x869   :  { %2660 = vmatprep.subr.mxu0 %v3092_v11 }
 0x86a   :  { %2661 = vmatpush3.msra.mxu0 %v3250_v18 }
 0x86b   :  { %2662 = vmatprep.subr.mxu0 %v3092_v11 }
 0x86c   :  { %2663 = vmatpush3.msra.mxu0 %v3256_v20 }
 0x86d   :  { %2678 = vmatprep.subr.mxu0 %v3092_v11 }
 0x874   :  { %v1092_v38 = vpop.permute.xlu1 %1091 }
 0x875   :  { %2654 = vmatmul.mubr.msk.f32.vlgmr.msra.gmra.mxu1 %vm132_vm0, %v1092_v38 }
 0x876   :  { %2668 = vmatpush3.msra.mxu1 %v3263_v21  ;;  %2675 = vmatprep.mubr.msk.f32.mxu1 %vm3093_vm1, %v3092_v11 }
 0x877   :  { %2669 = vmatprep.subr.mxu1 %v3092_v11 }
 0x878   :  { %2670 = vmatpush3.msra.mxu1 %v3270_v22 }
 0x879   :  { %2671 = vmatprep.subr.mxu1 %v3092_v11 }
 0x87a   :  { %2672 = vmatpush3.msra.mxu1 %v3276_v23 }
 0x87b   :  { %2673 = vmatprep.subr.mxu1 %v3092_v11 }
 0x87c   :  { %2674 = vmatpush3.msra.mxu1 %v3282_v24 }
 0x87d   :  { %2689 = vmatprep.subr.mxu1 %v3092_v11 }
 0x925   :  { %v1083_v42 = vpop.f32.mrf.mxu0 }
 0x926   :  { %v1087_v17 = vadd.f32 %v1083_v42, %v3322_v35 }
 0x927   :  { %v2644_v19 = vpop.f32.mrf.mxu0 }
 0x928   :  { %2869 = vtanh.f32 %v1087_v17  ;;  %v2372_v33 = vmul.f32 -1.442695, %v1087_v17 }
 0x935   :  { %v2870_v25 = vpop.eup %2869  ;;  %v1161_v26 = vpop.f32.mrf.mxu1 }
 0x936   :  { %v1165_v27 = vadd.f32 %v1161_v26, %v3343_v57  ;;  %1175 = vrot.lane.b32.xlu0 %v2870_v25, %s3094_s6 }
 0x937   :  { %v2655_v30 = vpop.f32.mrf.mxu1 }
 0x938   :  { %2871 = vtanh.f32 %v1165_v27  ;;  %v2373_v34 = vmul.f32 -1.442695, %v1165_v27 }
 0x939   :  { %2873 = vpow2.f32 %v2372_v33 }
 0x93a   :  { %2875 = vpow2.f32 %v2373_v34 }
 0x945   :  { %v2872_v31 = vpop.eup %2871 }
 0x946   :  { %1199 = vrot.lane.b32.xlu1 %v2872_v31, %s3094_s6  ;;  %v2874_v37 = vpop.eup %2873 }
 0x947   :  { %v1169_v39 = vadd.f32 1.0, %v2874_v37  ;;  %v2876_v35 = vpop.eup %2875 }
 0x948   :  { %v1193_v43 = vadd.f32 1.0, %v2876_v35 }
 0x949   :  { %2877 = vrcp.f32 %v1169_v39 }
 0x94a   :  { %2879 = vrcp.f32 %v1193_v43 }
 0x956   :  { %v2878_v44 = vpop.eup %2877 }
 0x957   :  { %v2880_v57 = vpop.eup %2879  ;;  %v1173_v52 = vmul.f32 %v2878_v44, %v3442_v0 }
 0x958   :  { %v1197_v56 = vmul.f32 %v2880_v57, %v3446_v61 }
 0x9a8   :  { %v1176_v46 = vpop.permute.xlu0 %1175 }
 0x9a9   :  { %v1178_v47 = vmul.f32 %v2878_v44, %v1176_v46 }
 0x9ab   :  { %1180 = vrot.lane.b32.xlu0 %v1178_v47, %s3095_s19 }
 0x9b8   :  { %v1200_v48 = vpop.permute.xlu1 %1199 }
 0x9b9   :  { %v1202_v50 = vmul.f32 %v2880_v57, %v1200_v48 }
 0x9bb   :  { %1204 = vrot.lane.b32.xlu1 %v1202_v50, %s3095_s19 }
 0xa1d   :  { %v1181_v40 = vpop.permute.xlu0 %1180 }
 0xa1e   :  { %v3490_v54 = vadd.f32 %v1181_v40, %v1173_v52 }
 0xa20   :  { %2881 = vtanh.f32 %v3490_v54 }
 0xa2d   :  { %v2882_v58 = vpop.eup %2881  ;;  %v1205_v59 = vpop.permute.xlu1 %1204 }
 0xa2e   :  { %v3494_v55 = vadd.f32 %v1205_v59, %v1197_v56  ;;  %1186 = vrot.lane.b32.xlu0 %v2882_v58, %s3094_s6 }
 0xa30   :  { %2883 = vtanh.f32 %v3494_v55 }
 0xa3d   :  { %v2884_v60 = vpop.eup %2883 }
 0xa3e   :  { %1210 = vrot.lane.b32.xlu1 %v2884_v60, %s3094_s6 }
 0xaa0   :  { %v1187_v62 = vpop.permute.xlu0 %1186 }
 0xaa1   :  { %v3499_v63 = vmul.f32 %v2878_v44, %v1187_v62 }
 0xaa3   :  { %v1214_v28 = vmax.f32 %v3453_v8, %v3499_v63  ;;  %1219 = vrot.lane.b32.xlu0 %v3499_v63, %s3095_s19 }
 0xab0   :  { %v1211_v0 = vpop.permute.xlu1 %1210 }
 0xab1   :  { %v3505_v1 = vmul.f32 %v2880_v57, %v1211_v0 }
 0xab3   :  { %v1215_v2 = vmax.f32 %v3458_v15, %v3505_v1  ;;  %1297 = vrot.lane.b32.xlu1 %v3505_v1, %s3095_s19 }
 0xb15   :  { %v1220_v3 = vpop.permute.xlu0 %1219 }
 0xb16   :  { %2665 = vmatmul.mubr.msk.f32.vlgmr.msra.gmra.mxu0 %vm132_vm0, %v1220_v3 }
 0xb17   :  { %2679 = vmatpush3.msra.mxu0 %v3225_v9  ;;  %2686 = vmatprep.mubr.msk.f32.mxu0 %vm3093_vm1, %v3092_v11 }
 0xb18   :  { %2680 = vmatprep.subr.mxu0 %v3092_v11 }
 0xb19   :  { %2681 = vmatpush3.msra.mxu0 %v3238_v14 }
 0xb1a   :  { %2682 = vmatprep.subr.mxu0 %v3092_v11 }
 0xb1b   :  { %2683 = vmatpush3.msra.mxu0 %v3250_v18 }
 0xb1c   :  { %2684 = vmatprep.subr.mxu0 %v3092_v11 }
 0xb1d   :  { %2685 = vmatpush3.msra.mxu0 %v3256_v20 }
 0xb1e   :  { %2700 = vmatprep.subr.mxu0 %v3092_v11 }
 0xb25   :  { %v1298_v61 = vpop.permute.xlu1 %1297 }
 0xb26   :  { %2676 = vmatmul.mubr.msk.f32.vlgmr.msra.gmra.mxu1 %vm132_vm0, %v1298_v61 }
 0xb27   :  { %2690 = vmatpush3.msra.mxu1 %v3263_v21  ;;  %2697 = vmatprep.mubr.msk.f32.mxu1 %vm3093_vm1, %v3092_v11 }
 0xb28   :  { %2691 = vmatprep.subr.mxu1 %v3092_v11 }
 0xb29   :  { %2692 = vmatpush3.msra.mxu1 %v3270_v22 }
 0xb2a   :  { %2693 = vmatprep.subr.mxu1 %v3092_v11 }
 0xb2b   :  { %2694 = vmatpush3.msra.mxu1 %v3276_v23 }
 0xb2c   :  { %2695 = vmatprep.subr.mxu1 %v3092_v11 }
 0xb2d   :  { %2696 = vmatpush3.msra.mxu1 %v3282_v24 }
 0xb2e   :  { %2711 = vmatprep.subr.mxu1 %v3092_v11 }
 0xbd6   :  { %v1289_v4 = vpop.f32.mrf.mxu0 }
 0xbd7   :  { %v1293_v5 = vadd.f32 %v1289_v4, %v3320_v32 }
 0xbd8   :  { %v2666_v6 = vpop.f32.mrf.mxu0 }
 0xbd9   :  { %2885 = vtanh.f32 %v1293_v5  ;;  %v2376_v38 = vmul.f32 -1.442695, %v1293_v5 }
 0xbe6   :  { %v2886_v7 = vpop.eup %2885  ;;  %v1367_v10 = vpop.f32.mrf.mxu1 }
 0xbe7   :  { %v1371_v12 = vadd.f32 %v1367_v10, %v3337_v51  ;;  %1381 = vrot.lane.b32.xlu0 %v2886_v7, %s3094_s6 }
 0xbe8   :  { %v2677_v13 = vpop.f32.mrf.mxu1 }
 0xbe9   :  { %2887 = vtanh.f32 %v1371_v12  ;;  %v2377_v42 = vmul.f32 -1.442695, %v1371_v12 }
 0xbea   :  { %2889 = vpow2.f32 %v2376_v38 }
 0xbeb   :  { %2891 = vpow2.f32 %v2377_v42 }
 0xbf6   :  { %v2888_v16 = vpop.eup %2887 }
 0xbf7   :  { %1405 = vrot.lane.b32.xlu1 %v2888_v16, %s3094_s6  ;;  %v2890_v17 = vpop.eup %2889 }
 0xbf8   :  { %v1375_v19 = vadd.f32 1.0, %v2890_v17  ;;  %v2892_v32 = vpop.eup %2891 }
 0xbf9   :  { %v1399_v25 = vadd.f32 1.0, %v2892_v32 }
 0xbfa   :  { %2893 = vrcp.f32 %v1375_v19 }
 0xbfb   :  { %2895 = vrcp.f32 %v1399_v25 }
 0xc07   :  { %v2894_v26 = vpop.eup %2893 }
 0xc08   :  { %v2896_v51 = vpop.eup %2895  ;;  %v1379_v34 = vmul.f32 %v2894_v26, %v3490_v54 }
 0xc09   :  { %v1403_v35 = vmul.f32 %v2896_v51, %v3494_v55 }
 0xc59   :  { %v1382_v27 = vpop.permute.xlu0 %1381 }
 0xc5a   :  { %v1384_v30 = vmul.f32 %v2894_v26, %v1382_v27 }
 0xc5c   :  { %1386 = vrot.lane.b32.xlu0 %v1384_v30, %s3095_s19 }
 0xc69   :  { %v1406_v31 = vpop.permute.xlu1 %1405 }
 0xc6a   :  { %v1408_v33 = vmul.f32 %v2896_v51, %v1406_v31  ;;  %v2955_v31 = vld [vmem:[#allocation4 + $0x18] sm:$0xff] }
 0xc6c   :  { %1410 = vrot.lane.b32.xlu1 %v1408_v33, %s3095_s19  ;;  %v2956_v33 = vld [vmem:[#allocation4 + $0x10] sm:$0xff] }
 0xcce   :  { %v1387_v37 = vpop.permute.xlu0 %1386 }
 0xccf   :  { %v3540_v39 = vadd.f32 %v1387_v37, %v1379_v34 }
 0xcd1   :  { %2897 = vtanh.f32 %v3540_v39 }
 0xcde   :  { %v2898_v43 = vpop.eup %2897  ;;  %v1411_v44 = vpop.permute.xlu1 %1410 }
 0xcdf   :  { %v3544_v46 = vadd.f32 %v1411_v44, %v1403_v35  ;;  %1392 = vrot.lane.b32.xlu0 %v2898_v43, %s3094_s6 }
 0xce1   :  { %2899 = vtanh.f32 %v3544_v46 }
 0xcee   :  { %v2900_v47 = vpop.eup %2899 }
 0xcef   :  { %1416 = vrot.lane.b32.xlu1 %v2900_v47, %s3094_s6 }
 0xd51   :  { %v1393_v57 = vpop.permute.xlu0 %1392 }
 0xd52   :  { %v1395_v48 = vmul.f32 %v2894_v26, %v1393_v57 }
 0xd54   :  { %v3552_v50 = vmax.f32 %v1214_v28, %v1395_v48  ;;  %1425 = vrot.lane.b32.xlu0 %v1395_v48, %s3095_s19 }
 0xd61   :  { %v1417_v52 = vpop.permute.xlu1 %1416 }
 0xd62   :  { %v1419_v40 = vmul.f32 %v2896_v51, %v1417_v52 }
 0xd64   :  { %v3558_v54 = vmax.f32 %v1215_v2, %v1419_v40  ;;  %1503 = vrot.lane.b32.xlu1 %v1419_v40, %s3095_s19 }
 0xdc6   :  { %v1426_v56 = vpop.permute.xlu0 %1425 }
 0xdc7   :  { %2687 = vmatmul.mubr.msk.f32.vlgmr.msra.gmra.mxu0 %vm132_vm0, %v1426_v56 }
 0xdc8   :  { %2701 = vmatpush3.msra.mxu0 %v3225_v9  ;;  %2708 = vmatprep.mubr.msk.f32.mxu0 %vm3093_vm1, %v3092_v11 }
 0xdc9   :  { %2702 = vmatprep.subr.mxu0 %v3092_v11 }
 0xdca   :  { %2703 = vmatpush3.msra.mxu0 %v3238_v14 }
 0xdcb   :  { %2704 = vmatprep.subr.mxu0 %v3092_v11 }
 0xdcc   :  { %2705 = vmatpush3.msra.mxu0 %v3250_v18 }
 0xdcd   :  { %2706 = vmatprep.subr.mxu0 %v3092_v11 }
 0xdce   :  { %2707 = vmatpush3.msra.mxu0 %v3256_v20 }
 0xdcf   :  { %2722 = vmatprep.subr.mxu0 %v3092_v11 }
 0xdd6   :  { %v1504_v8 = vpop.permute.xlu1 %1503 }
 0xdd7   :  { %2698 = vmatmul.mubr.msk.f32.vlgmr.msra.gmra.mxu1 %vm132_vm0, %v1504_v8 }
 0xdd8   :  { %2712 = vmatpush3.msra.mxu1 %v3263_v21  ;;  %2719 = vmatprep.mubr.msk.f32.mxu1 %vm3093_vm1, %v3092_v11 }
 0xdd9   :  { %2713 = vmatprep.subr.mxu1 %v3092_v11 }
 0xdda   :  { %2714 = vmatpush3.msra.mxu1 %v3270_v22 }
 0xddb   :  { %2715 = vmatprep.subr.mxu1 %v3092_v11 }
 0xddc   :  { %2716 = vmatpush3.msra.mxu1 %v3276_v23 }
 0xddd   :  { %2717 = vmatprep.subr.mxu1 %v3092_v11 }
 0xdde   :  { %2718 = vmatpush3.msra.mxu1 %v3282_v24 }
 0xddf   :  { %2733 = vmatprep.subr.mxu1 %v3092_v11 }
 0xe87   :  { %v1495_v9 = vpop.f32.mrf.mxu0 }
 0xe88   :  { %v1499_v14 = vadd.f32 %v1495_v9, %v3318_v29 }
 0xe89   :  { %v2688_v15 = vpop.f32.mrf.mxu0 }
 0xe8a   :  { %2901 = vtanh.f32 %v1499_v14  ;;  %v2380_v63 = vmul.f32 -1.442695, %v1499_v14 }
 0xe97   :  { %v2902_v58 = vpop.eup %2901  ;;  %v1573_v59 = vpop.f32.mrf.mxu1 }
 0xe98   :  { %v1577_v55 = vadd.f32 %v1573_v59, %v3339_v53  ;;  %1587 = vrot.lane.b32.xlu0 %v2902_v58, %s3094_s6 }
 0xe99   :  { %v2699_v60 = vpop.f32.mrf.mxu1 }
 0xe9a   :  { %2903 = vtanh.f32 %v1577_v55  ;;  %v2381_v28 = vmul.f32 -1.442695, %v1577_v55 }
 0xe9b   :  { %2905 = vpow2.f32 %v2380_v63 }
 0xe9c   :  { %2907 = vpow2.f32 %v2381_v28 }
 0xea7   :  { %v2904_v62 = vpop.eup %2903 }
 0xea8   :  { %1611 = vrot.lane.b32.xlu1 %v2904_v62, %s3094_s6  ;;  %v2906_v0 = vpop.eup %2905 }
 0xea9   :  { %v1581_v1 = vadd.f32 1.0, %v2906_v0  ;;  %v2908_v29 = vpop.eup %2907 }
 0xeaa   :  { %v1605_v2 = vadd.f32 1.0, %v2908_v29 }
 0xeab   :  { %2909 = vrcp.f32 %v1581_v1 }
 0xeac   :  { %2911 = vrcp.f32 %v1605_v2 }
 0xeb8   :  { %v2910_v3 = vpop.eup %2909 }
 0xeb9   :  { %v2912_v53 = vpop.eup %2911  ;;  %v1585_v7 = vmul.f32 %v2910_v3, %v3540_v39 }
 0xeba   :  { %v1609_v13 = vmul.f32 %v2912_v53, %v3544_v46 }
 0xf0a   :  { %v1588_v61 = vpop.permute.xlu0 %1587 }
 0xf0b   :  { %v1590_v4 = vmul.f32 %v2910_v3, %v1588_v61 }
 0xf0d   :  { %1592 = vrot.lane.b32.xlu0 %v1590_v4, %s3095_s19 }
 0xf1a   :  { %v1612_v5 = vpop.permute.xlu1 %1611 }
 0xf1b   :  { %v1614_v6 = vmul.f32 %v2912_v53, %v1612_v5 }
 0xf1d   :  { %1616 = vrot.lane.b32.xlu1 %v1614_v6, %s3095_s19 }
 0xf7f   :  { %v1593_v10 = vpop.permute.xlu0 %1592 }
 0xf80   :  { %v3590_v12 = vadd.f32 %v1593_v10, %v1585_v7 }
 0xf82   :  { %2913 = vtanh.f32 %v3590_v12 }
 0xf8f   :  { %v2914_v16 = vpop.eup %2913  ;;  %v1617_v38 = vpop.permute.xlu1 %1616 }
 0xf90   :  { %v3594_v42 = vadd.f32 %v1617_v38, %v1609_v13  ;;  %1598 = vrot.lane.b32.xlu0 %v2914_v16, %s3094_s6 }
 0xf92   :  { %2915 = vtanh.f32 %v3594_v42 }
 0xf9f   :  { %v2916_v17 = vpop.eup %2915 }
 0xfa0   :  { %1622 = vrot.lane.b32.xlu1 %v2916_v17, %s3094_s6 }
0x1002   :  { %v1599_v19 = vpop.permute.xlu0 %1598 }
0x1003   :  { %v3599_v32 = vmul.f32 %v2910_v3, %v1599_v19 }
0x1005   :  { %v1626_v25 = vmax.f32 %v3552_v50, %v3599_v32  ;;  %1631 = vrot.lane.b32.xlu0 %v3599_v32, %s3095_s19 }
0x1012   :  { %v1623_v26 = vpop.permute.xlu1 %1622 }
0x1013   :  { %v3605_v27 = vmul.f32 %v2912_v53, %v1623_v26 }
0x1015   :  { %v1627_v30 = vmax.f32 %v3558_v54, %v3605_v27  ;;  %1709 = vrot.lane.b32.xlu1 %v3605_v27, %s3095_s19 }
0x1077   :  { %v1632_v51 = vpop.permute.xlu0 %1631 }
0x1078   :  { %2709 = vmatmul.mubr.msk.f32.vlgmr.msra.gmra.mxu0 %vm132_vm0, %v1632_v51 }
0x1079   :  { %2723 = vmatpush3.msra.mxu0 %v2955_v31  ;;  %2730 = vmatprep.mubr.msk.f32.mxu0 %vm3093_vm1, %v3092_v11 }
0x107a   :  { %2724 = vmatprep.subr.mxu0 %v3092_v11 }
0x107b   :  { %2725 = vmatpush3.msra.mxu0 %v2956_v33 }
0x107c   :  { %2726 = vmatprep.subr.mxu0 %v3092_v11 }
0x107d   :  { %2727 = vmatpush3.msra.mxu0 %v3250_v18 }
0x107e   :  { %2728 = vmatprep.subr.mxu0 %v3092_v11 }
0x107f   :  { %2729 = vmatpush3.msra.mxu0 %v3256_v20 }
0x1080   :  { %2744 = vmatprep.subr.mxu0 %v3092_v11 }
0x1087   :  { %v1710_v34 = vpop.permute.xlu1 %1709 }
0x1088   :  { %2720 = vmatmul.mubr.msk.f32.vlgmr.msra.gmra.mxu1 %vm132_vm0, %v1710_v34 }
0x1089   :  { %2734 = vmatpush3.msra.mxu1 %v3263_v21  ;;  %2741 = vmatprep.mubr.msk.f32.mxu1 %vm3093_vm1, %v3092_v11 }
0x108a   :  { %2735 = vmatprep.subr.mxu1 %v3092_v11 }
0x108b   :  { %2736 = vmatpush3.msra.mxu1 %v3270_v22 }
0x108c   :  { %2737 = vmatprep.subr.mxu1 %v3092_v11 }
0x108d   :  { %2738 = vmatpush3.msra.mxu1 %v3276_v23 }
0x108e   :  { %2739 = vmatprep.subr.mxu1 %v3092_v11 }
0x108f   :  { %2740 = vmatpush3.msra.mxu1 %v3282_v24 }
0x1090   :  { %2763 = vmatprep.subr.mxu1 %v3092_v11 }
0x1138   :  { %v1701_v18 = vpop.f32.mrf.mxu0 }
0x1139   :  { %v1705_v20 = vadd.f32 %v1701_v18, %v3328_v41 }
0x113a   :  { %v2710_v21 = vpop.f32.mrf.mxu0 }
0x113b   :  { %2917 = vtanh.f32 %v1705_v20  ;;  %v2384_v43 = vmul.f32 -1.442695, %v1705_v20  ;;  %v2145_v20 = vld [vmem:[#allocation10 + $0x38] sm:$0xff]  ;;  %v2144_v21 = vld [vmem:[#allocation10 + $0x30] sm:$0xff] }
0x1148   :  { %v2918_v37 = vpop.eup %2917  ;;  %v1779_v39 = vpop.f32.mrf.mxu1 }
0x1149   :  { %v1783_v35 = vadd.f32 %v1779_v39, %v3333_v45  ;;  %1793 = vrot.lane.b32.xlu0 %v2918_v37, %s3094_s6  ;;  %v2143_v37 = vld [vmem:[#allocation10 + $0x28] sm:$0xff]  ;;  %v2142_v39 = vld [vmem:[#allocation10 + $0x20] sm:$0xff] }
0x114a   :  { %v2721_v22 = vpop.f32.mrf.mxu1 }
0x114b   :  { %2919 = vtanh.f32 %v1783_v35  ;;  %v2385_v24 = vmul.f32 -1.442695, %v1783_v35  ;;  %v2141_v35 = vld [vmem:[#allocation10 + $0x18] sm:$0xff]  ;;  %v2140_v22 = vld [vmem:[#allocation10 + $0x10] sm:$0xff] }
0x114c   :  { %2921 = vpow2.f32 %v2384_v43 }
0x114d   :  { %2923 = vpow2.f32 %v2385_v24  ;;  %v2139_v24 = vld [vmem:[#allocation10 + $0x8] sm:$0xff] }
0x1158   :  { %v2920_v23 = vpop.eup %2919 }
0x1159   :  { %1817 = vrot.lane.b32.xlu1 %v2920_v23, %s3094_s6  ;;  %v2922_v44 = vpop.eup %2921 }
0x115a   :  { %v1787_v46 = vadd.f32 1.0, %v2922_v44  ;;  %v2924_v41 = vpop.eup %2923 }
0x115b   :  { %v1811_v47 = vadd.f32 1.0, %v2924_v41  ;;  %v2138_v41 = vld [vmem:[#allocation10] sm:$0xff] }
0x115c   :  { %2925 = vrcp.f32 %v1787_v46  ;;  %v2056_v46 = vld [vmem:[%s3742_s7 + $0x38] sm:$0xff] }
0x115d   :  { %2927 = vrcp.f32 %v1811_v47  ;;  %v2055_v47 = vld [vmem:[%s3742_s7 + $0x30] sm:$0xff] }
0x1169   :  { %v2926_v57 = vpop.eup %2925 }
0x116a   :  { %v2928_v45 = vpop.eup %2927  ;;  %v1791_v8 = vmul.f32 %v2926_v57, %v3590_v12 }
0x116b   :  { %v1815_v15 = vmul.f32 %v2928_v45, %v3594_v42 }
0x11bb   :  { %v1794_v48 = vpop.permute.xlu0 %1793 }
0x11bc   :  { %v1796_v52 = vmul.f32 %v2926_v57, %v1794_v48  ;;  %v2053_v48 = vld [vmem:[%s3742_s7 + $0x20] sm:$0xff] }
0x11be   :  { %1798 = vrot.lane.b32.xlu0 %v1796_v52, %s3095_s19  ;;  %v2052_v52 = vld [vmem:[%s3742_s7 + $0x18] sm:$0xff] }
0x11cb   :  { %v1818_v40 = vpop.permute.xlu1 %1817 }
0x11cc   :  { %v1820_v56 = vmul.f32 %v2928_v45, %v1818_v40  ;;  %v2051_v40 = vld [vmem:[%s3742_s7 + $0x10] sm:$0xff] }
0x11ce   :  { %1822 = vrot.lane.b32.xlu1 %v1820_v56, %s3095_s19 }
0x1230   :  { %v1799_v9 = vpop.permute.xlu0 %1798 }
0x1231   :  { %v1801_v14 = vadd.f32 %v1799_v9, %v1791_v8  ;;  %v2050_v8 = vld [vmem:[%s3742_s7 + $0x8] sm:$0xff] }
0x1233   :  { %2929 = vtanh.f32 %v1801_v14 }
0x1240   :  { %v2930_v58 = vpop.eup %2929  ;;  %v1823_v59 = vpop.permute.xlu1 %1822 }
0x1241   :  { %v1825_v55 = vadd.f32 %v1823_v59, %v1815_v15  ;;  %1804 = vrot.lane.b32.xlu0 %v2930_v58, %s3094_s6 }
0x1243   :  { %2931 = vtanh.f32 %v1825_v55 }
0x1250   :  { %v2932_v60 = vpop.eup %2931 }
0x1251   :  { %1828 = vrot.lane.b32.xlu1 %v2932_v60, %s3094_s6  ;;  %v2243_v60 = vld [vmem:[#allocation12 + $0x38] sm:$0xff] }
0x12b3   :  { %v1805_v62 = vpop.permute.xlu0 %1804 }
0x12b4   :  { %v1807_v63 = vmul.f32 %v2926_v57, %v1805_v62  ;;  %v2054_v57 = vld [vmem:[%s3742_s7 + $0x28] sm:$0xff]  ;;  %v2242_v62 = vld [vmem:[#allocation12 + $0x30] sm:$0xff] }
0x12b6   :  { %v3644_v28 = vmax.f32 %v1626_v25, %v1807_v63  ;;  %1837 = vrot.lane.b32.xlu0 %v1807_v63, %s3095_s19  ;;  %v2241_v63 = vld [vmem:[#allocation12 + $0x28] sm:$0xff] }
0x12c3   :  { %v1829_v0 = vpop.permute.xlu1 %1828 }
0x12c4   :  { %v1831_v1 = vmul.f32 %v2928_v45, %v1829_v0  ;;  %v2239_v0 = vld [vmem:[#allocation12 + $0x18] sm:$0xff] }
0x12c6   :  { %v3650_v29 = vmax.f32 %v1627_v30, %v1831_v1  ;;  %1914 = vrot.lane.b32.xlu1 %v1831_v1, %s3095_s19  ;;  %v2238_v1 = vld [vmem:[#allocation12 + $0x10] sm:$0xff] }
0x1328   :  { %v1838_v2 = vpop.permute.xlu0 %1837 }
0x1329   :  { %2731 = vmatmul.mubr.msk.f32.vlgmr.msra.gmra.mxu0 %vm132_vm0, %v1838_v2  ;;  %v2236_v2 = vld [vmem:[#allocation12] sm:$0xff] }
0x132a   :  { %2760 = vmatprep.mubr.msk.f32.mxu0 %vm3093_vm1, %v3092_v11  ;;  %2745 = vmatpush3.msra.mxu0 %v2056_v46 }
0x132b   :  { %2746 = vmatprep.subr.mxu0 %v3092_v11 }
0x132c   :  { %2747 = vmatpush3.msra.mxu0 %v2055_v47 }
0x132d   :  { %2748 = vmatprep.subr.mxu0 %v3092_v11 }
0x132e   :  { %2749 = vmatpush3.msra.mxu0 %v2054_v57 }
0x132f   :  { %2750 = vmatprep.subr.mxu0 %v3092_v11 }
0x1330   :  { %2751 = vmatpush3.msra.mxu0 %v2053_v48 }
0x1331   :  { %2752 = vmatprep.subr.mxu0 %v3092_v11 }
0x1332   :  { %2753 = vmatpush3.msra.mxu0 %v2052_v52 }
0x1333   :  { %2754 = vmatprep.subr.mxu0 %v3092_v11 }
0x1334   :  { %2755 = vmatpush3.msra.mxu0 %v2051_v40 }
0x1335   :  { %2756 = vmatprep.subr.mxu0 %v3092_v11 }
0x1336   :  { %2757 = vmatpush3.msra.mxu0 %v2050_v8 }
0x1337   :  { %2758 = vmatprep.subr.mxu0 %v3092_v11 }
0x1338   :  { %v1915_v50 = vpop.permute.xlu1 %1914 }
0x1339   :  { %2742 = vmatmul.mubr.msk.f32.vlgmr.msra.gmra.mxu1 %vm132_vm0, %v1915_v50  ;;  %v2392_v50 = vld [vmem:[%s3745_s10] ss:$0 sm:$0xff] }
0x133a   :  { %2779 = vmatprep.mubr.msk.f32.mxu1 %vm3093_vm1, %v3092_v11  ;;  %2764 = vmatpush3.msra.mxu1 %v2145_v20 }
0x133b   :  { %2765 = vmatprep.subr.mxu1 %v3092_v11 }
0x133c   :  { %2766 = vmatpush3.msra.mxu1 %v2144_v21 }
0x133d   :  { %2767 = vmatprep.subr.mxu1 %v3092_v11 }
0x133e   :  { %2768 = vmatpush3.msra.mxu1 %v2143_v37 }
0x133f   :  { %2769 = vmatprep.subr.mxu1 %v3092_v11 }
0x1340   :  { %2770 = vmatpush3.msra.mxu1 %v2142_v39 }
0x1341   :  { %2771 = vmatprep.subr.mxu1 %v3092_v11 }
0x1342   :  { %2772 = vmatpush3.msra.mxu1 %v2141_v35 }
0x1343   :  { %2773 = vmatprep.subr.mxu1 %v3092_v11 }
0x1344   :  { %2774 = vmatpush3.msra.mxu1 %v2140_v22 }
0x1345   :  { %2775 = vmatprep.subr.mxu1 %v3092_v11 }
0x1346   :  { %2776 = vmatpush3.msra.mxu1 %v2139_v24 }
0x1347   :  { %2777 = vmatprep.subr.mxu1 %v3092_v11 }
0x1348   :  { %2778 = vmatpush3.msra.mxu1 %v2138_v41 }
0x13e9   :  { %v1907_v3 = vpop.f32.mrf.mxu0 }
0x13ea   :  { %v1911_v61 = vadd.f32 %v1907_v3, %v3324_v36 }
0x13eb   :  { %v2732_v54 = vpop.f32.mrf.mxu0 }
0x13ec   :  { %2933 = vtanh.f32 %v1911_v61  ;;  %v2388_v10 = vmul.f32 -1.442695, %v1911_v61 }
0x13f9   :  { %v2934_v4 = vpop.eup %2933  ;;  %v1984_v53 = vpop.f32.mrf.mxu1 }
0x13fa   :  { %v1988_v5 = vadd.f32 %v1984_v53, %v3335_v49  ;;  %1998 = vrot.lane.b32.xlu0 %v2934_v4, %s3094_s6 }
0x13fb   :  { %v2743_v6 = vpop.f32.mrf.mxu1 }
0x13fc   :  { %2935 = vtanh.f32 %v1988_v5  ;;  %v2389_v12 = vmul.f32 -1.442695, %v1988_v5 }
0x13fd   :  { %2937 = vpow2.f32 %v2388_v10  ;;  %v2390_v10 = vld [vmem:[%s3743_s8] ss:$0 sm:$0xff]  ;;  %s3057_s8 = scalar_lea.vmem %s2332_s17, 128 }
0x13fe   :  { %2939 = vpow2.f32 %v2389_v12  ;;  %p3058_p11 = scmp.ne.s32.totalorder %s2332_s17, %s3057_s8  ;;  %p3063_p13 = scmp.lt.s32.totalorder %s3057_s8, %s3057_s8 }
0x1400   :  { %p3064_p0 = por %p3063_p13, %p3062_p12 }
0x1402   :  { %p3065_p1 = pnand %p3064_p0, %p3058_p11 }
0x1409   :  { %v2936_v7 = vpop.eup %2935 }
0x140a   :  { %2022 = vrot.lane.b32.xlu1 %v2936_v7, %s3094_s6  ;;  %v2938_v13 = vpop.eup %2937 }
0x140b   :  { %v1992_v16 = vadd.f32 1.0, %v2938_v13  ;;  %v2940_v36 = vpop.eup %2939 }
0x140c   :  { %v2016_v38 = vadd.f32 1.0, %v2940_v36 }
0x140d   :  { %2941 = vrcp.f32 %v1992_v16 }
0x140e   :  { %2943 = vrcp.f32 %v2016_v38 }
0x141a   :  { %v2942_v42 = vpop.eup %2941 }
0x141b   :  { %v2944_v49 = vpop.eup %2943  ;;  %v1996_v26 = vmul.f32 %v2942_v42, %v1801_v14  ;;  %v2049_v14 = vld [vmem:[%s3742_s7] sm:$0xff] }
0x141c   :  { %v2020_v51 = vmul.f32 %v2944_v49, %v1825_v55  ;;  %2759 = vmatpush3.msra.mxu0 %v2049_v14 }
0x141d   :  { %2782 = vmatprep.subr.mxu0 %v3092_v11 }
0x146c   :  { %v1999_v17 = vpop.permute.xlu0 %1998 }
0x146d   :  { %v2001_v19 = vmul.f32 %v2942_v42, %v1999_v17 }
0x146f   :  { %2003 = vrot.lane.b32.xlu0 %v2001_v19, %s3095_s19 }
0x147c   :  { %v2023_v32 = vpop.permute.xlu1 %2022 }
0x147d   :  { %v2025_v25 = vmul.f32 %v2944_v49, %v2023_v32 }
0x147f   :  { %2027 = vrot.lane.b32.xlu1 %v2025_v25, %s3095_s19 }
0x14e1   :  { %v2004_v27 = vpop.permute.xlu0 %2003 }
0x14e2   :  { %v2006_v30 = vadd.f32 %v2004_v27, %v1996_v26 }
0x14e4   :  { %2945 = vtanh.f32 %v2006_v30 }
0x14f1   :  { %v2946_v31 = vpop.eup %2945  ;;  %v2028_v33 = vpop.permute.xlu1 %2027 }
0x14f2   :  { %v2030_v34 = vadd.f32 %v2028_v33, %v2020_v51  ;;  %2009 = vrot.lane.b32.xlu0 %v2946_v31, %s3094_s6 }
0x14f4   :  { %2947 = vtanh.f32 %v2030_v34 }
0x1501   :  { %v2948_v18 = vpop.eup %2947 }
0x1502   :  { %2033 = vrot.lane.b32.xlu1 %v2948_v18, %s3094_s6 }
0x1564   :  { %v2010_v23 = vpop.permute.xlu0 %2009 }
0x1565   :  { %v2012_v43 = vmul.f32 %v2942_v42, %v2010_v23  ;;  %v2395_v42 = vld [vmem:[%s3747_s12] ss:$0 sm:$0xff] }
0x1567   :  { %v2037_v44 = vmax.f32 %v3644_v28, %v2012_v43  ;;  %v2240_v28 = vld [vmem:[#allocation12 + $0x20] sm:$0xff] }
0x1569   :  { %2040 = vrot.lane.b32.xlu0 %v2037_v44, %s3095_s19 }
0x1574   :  { %v2034_v45 = vpop.permute.xlu1 %2033 }
0x1575   :  { %v2036_v56 = vmul.f32 %v2944_v49, %v2034_v45 }
0x1577   :  { %v2038_v9 = vmax.f32 %v3650_v29, %v2036_v56  ;;  %v2237_v29 = vld [vmem:[#allocation12 + $0x8] sm:$0xff] }
0x1579   :  { %2044 = vrot.lane.b32.xlu1 %v2038_v9, %s3094_s6 }
0x15db   :  { %v2041_v15 = vpop.permute.xlu0 %2040 }
0x15eb   :  { %v2045_v58 = vpop.permute.xlu1 %2044 }
0x15ec   :  { %v2047_v59 = vsel %vm132_vm0, %v2041_v15, %v2045_v58 }
0x15ed   :  { %2949 = vtanh.f32 %v2047_v59  ;;  %2780 = vmatmul.mubr.msk.f32.vlgmr.msra.gmra.mxu1 %vm2064_vm2, %v2047_v59 }
0x15fa   :  { %v2950_v55 = vpop.eup %2949 }
0x15fb   :  { %2761 = vmatmul.mubr.msk.f32.vlgmr.msra.gmra.mxu0 %vm2064_vm2, %v2950_v55 }
0x15fc   :  { %2798 = vmatprep.mubr.msk.f32.mxu0 %vm3093_vm1, %v3092_v11  ;;  %2783 = vmatpush3.msra.mxu0 %v2243_v60 }
0x15fd   :  { %2784 = vmatprep.subr.mxu0 %v3092_v11 }
0x15fe   :  { %2785 = vmatpush3.msra.mxu0 %v2242_v62 }
0x15ff   :  { %2786 = vmatprep.subr.mxu0 %v3092_v11 }
0x1600   :  { %2787 = vmatpush3.msra.mxu0 %v2241_v63 }
0x1601   :  { %2788 = vmatprep.subr.mxu0 %v3092_v11 }
0x1602   :  { %2789 = vmatpush3.msra.mxu0 %v2240_v28 }
0x1603   :  { %2790 = vmatprep.subr.mxu0 %v3092_v11 }
0x1604   :  { %2791 = vmatpush3.msra.mxu0 %v2239_v0 }
0x1605   :  { %2792 = vmatprep.subr.mxu0 %v3092_v11 }
0x1606   :  { %2793 = vmatpush3.msra.mxu0 %v2238_v1 }
0x1607   :  { %2794 = vmatprep.subr.mxu0 %v3092_v11 }
0x1608   :  { %2795 = vmatpush3.msra.mxu0 %v2237_v29 }
0x1609   :  { %2796 = vmatprep.subr.mxu0 %v3092_v11 }
0x160a   :  { %2797 = vmatpush3.msra.mxu0 %v2236_v2 }
0x16ad   :  { %v2222_v3 = vpop.f32.mrf.mxu1 }
0x16ae   :  { %v2223_v61 = vadd.f32 %v2392_v50, %v2222_v3 }
0x16af   :  { %v2781_v54 = vpop.f32.mrf.mxu1 }
0x16b0   :  { %v2394_v4 = vmul.f32 -1.442695, %v2223_v61 }
0x16b2   :  { %2951 = vpow2.f32 %v2394_v4 }
0x16bb   :  { %v2134_v53 = vpop.f32.mrf.mxu0 }
0x16bc   :  { %v2135_v12 = vadd.f32 %v2390_v10, %v2134_v53 }
0x16bd   :  { %v2762_v5 = vpop.f32.mrf.mxu0 }
0x16bf   :  { %v2952_v6 = vpop.eup %2951 }
0x16c0   :  { %v2229_v7 = vadd.f32 1.0, %v2952_v6 }
0x16c2   :  { %2953 = vrcp.f32 %v2229_v7 }
0x16cf   :  { %v2954_v11 = vpop.eup %2953 }
0x16d0   :  { %v2233_v13 = vsub.f32 1.0, %v2954_v11  ;;  %v2232_v16 = vmul.f32 %v2954_v11, %v2135_v12 }
0x16d2   :  { %v2234_v36 = vmul.f32 %v2233_v13, %v2047_v59 }
0x16d4   :  { %v2235_v38 = vadd.f32 %v2234_v36, %v2232_v16 }
0x16d6   :  { %2799 = vmatmul.mubr.msk.f32.vlgmr.msra.gmra.mxu0 %vm2064_vm2, %v2235_v38 }
0x1796   :  { %v2320_v17 = vpop.f32.mrf.mxu0 }
0x1797   :  { %v2321_v19 = vadd.f32 %v2395_v42, %v2320_v17 }
0x1798   :  { %v2800_v49 = vpop.f32.mrf.mxu0 }
0x1799   :  { %2324 = vst [vmem:[#allocation13] sm:$0xff] %v2321_v19 }
0x179a   :  { %3068 = shalt.err (!%p3065_p1)
}
0x179b   :  { %2334 = dma.vmem_to_hbm [thread:$0]  %s2332_s17, 128, %s3748_s13, [#allocation6]  }
0x179c   :  { %3083 = dma.done.wait [#allocation6], 128  }
0x179d   :  { %3084 = vsyncadd [#allocation6], 4294967168 }
0x179e   :  { %2338 = vsyncpa [#allocation5], 1 }
0x179f   :  { %2339 = vsyncpa [#allocation8], 1 }
0x17a0   :  { %2340 = vsyncpa [#allocation11], 1 }
0x17a1   :  { %2341 = vsyncpa [#allocation6], 1 }

</bundles_post_ra>
